<compile_context>
chip_gen: v6e
topology: v6e:2x2x1
jax: 0.10.0
libtpu: 0.0.40
codegen_flags: <defaults>
</compile_context>

<pallas_src>
import functools

import jax
import jax.numpy as jnp
import numpy as np
from jax.experimental import pallas as pl
from jax.experimental.pallas import tpu as pltpu

BN_EPS = 1e-5
_LANES = 128


def _silu(v):
    """SiLU with the sigmoid divide kept off the VALU.

    exp and the approximate reciprocal both issue on the (otherwise idle) EUP
    slot; one Newton step restores ~full f32 precision so the reference check
    still holds at tight tolerance.
    """
    d = 1.0 + jnp.exp(-v)
    r = pl.reciprocal(d, approx=True)
    r = r * (2.0 - d * r)          # Newton refinement: error ~ eps^2
    return v * r


# ----------------------------------------------------------------------------
# Fused kernel: 1x1 conv+BN+SiLU -> depthwise kxk+BN+SiLU -> 1x1 conv+BN
# ----------------------------------------------------------------------------
def _fused_ib_kernel(x_ref, w1_ref, b1_ref, w2_ref, b2_ref, w3_ref, b3_ref,
                     o_ref, *, k, c1, c_mid, c2, h, w, b_pack):
    """One packed slab (b_pack images side-by-side on lanes) per grid step.

    x_ref  : (1, c1, h, b_pack*w)   VMEM input block (lane-dense)
    w1_ref : (c_mid*c1,)            SMEM  folded 1x1 expand weights [co*c1+ci]
    b1_ref : (c_mid,)               SMEM  folded bias
    w2_ref : (c_mid*k*k,)           SMEM  folded depthwise taps [c*k*k+dy*k+dx]
    b2_ref : (c_mid,)               SMEM  folded bias
    w3_ref : (c2*c_mid,)            SMEM  folded 1x1 project weights [co*c_mid+ci]
    b3_ref : (c2,)                  SMEM  folded bias
    o_ref  : (1, c2, h, b_pack*w)   VMEM output block (lane-dense stores)
    """
    p = k // 2
    L = b_pack * w
    kk = k * k

    # --- per-step constants: image-boundary masks for the shifted taps ------
    # One iota compare per shift, hoisted out of every channel/tap loop.  The
    # masks also cover the roll wrap-around columns/rows, so the rolls never
    # leak data between packed images or across the array edge.
    lane = jax.lax.broadcasted_iota(jnp.int32, (h, L), 1)
    row = jax.lax.broadcasted_iota(jnp.int32, (h, L), 0)
    if w & (w - 1) == 0:
        x_local = jnp.bitwise_and(lane, w - 1)   # column index inside each image
    else:
        x_local = lane % w
    col_ok, row_ok = {}, {}
    for s in range(-p, p + 1):
        if s > 0:
            col_ok[s] = x_local < (w - s)
            row_ok[s] = row < (h - s)
        elif s < 0:
            col_ok[s] = x_local >= (-s)
            row_ok[s] = row >= (-s)

    # --- stage 1: 1x1 expand (+folded BN) + SiLU — VPU broadcast-MAC over c1 -
    # Channel loops unroll at trace time; fine for 4..8 channels.
    xs = [x_ref[0, ci].astype(jnp.float32) for ci in range(c1)]
    ys = []
    for co in range(c_mid):
        acc = xs[0] * w1_ref[co * c1]
        for ci in range(1, c1):
            acc = acc + xs[ci] * w1_ref[co * c1 + ci]
        ys.append(_silu(acc + b1_ref[co]))

    # --- stage 2: depthwise kxk (+folded BN) + SiLU — rolls + masks, no scratch
    # Factored k + k shifts per channel: k column-shifted (masked) copies once,
    # weight-combine per row offset, then k row shifts of the combined sums.
    zs = []
    for c in range(c_mid):
        y = ys[c]
        cols = []
        for sx in range(-p, p + 1):
            if sx == 0:
                cols.append(y)
            else:
                rolled = pltpu.roll(y, shift=(-sx) % L, axis=1)   # XLU lane rotate
                cols.append(jnp.where(col_ok[sx], rolled, 0.0))
        acc = None
        for sy in range(-p, p + 1):
            base = c * kk + (sy + p) * k
            inner = cols[0] * w2_ref[base]
            for j in range(1, k):
                inner = inner + cols[j] * w2_ref[base + j]
            if sy != 0:
                rolled = pltpu.roll(inner, shift=(-sy) % h, axis=0)  # XLU sublane rotate
                inner = jnp.where(row_ok[sy], rolled, 0.0)
            acc = inner if acc is None else acc + inner
        zs.append(_silu(acc + b2_ref[c]))

    # --- stage 3: 1x1 project (+folded BN), no activation --------------------
    # TODO(synk): for c_mid >= ~32, route stages 1/3 through the MXU as
    # channels-last (H*W, Cin) @ (Cin, Cout) matmuls instead of VPU MACs.
    for co in range(c2):
        acc = zs[0] * w3_ref[co * c_mid]
        for ci in range(1, c_mid):
            acc = acc + zs[ci] * w3_ref[co * c_mid + ci]
        o_ref[0, co] = (acc + b3_ref[co]).astype(o_ref.dtype)   # lane-dense store


# ----------------------------------------------------------------------------
# Host-side glue: BN folding, lane packing, pallas_call wrapper.
# ----------------------------------------------------------------------------
def _fold_bn(wgt, conv_bias, gamma, beta, mean, var, eps=BN_EPS):
    """Fold inference BatchNorm into the conv weights (output channel on the
    last weight axis) and a single per-channel bias."""
    scale = gamma / jnp.sqrt(var + eps)
    return wgt * scale[None, :], (conv_bias - mean) * scale + beta


def inverted_bottleneck_forward(x_nchw, p, *, k=3, stride=1):
    # TODO(synk): only stride==1 (the module default) is implemented in the
    # Pallas path; strided depthwise needs strided output addressing.
    assert stride == 1, "only stride=1 supported"
    assert k % 2 == 1, "depthwise pad=k//2 assumes odd k (PyTorch autopad)"
    n, c1, h, w = x_nchw.shape
    c_mid = p["w1"].shape[1]
    c2 = p["w3"].shape[1]

    # Fold BN (+conv bias) into the weights host-side (once, free) and flatten
    # the SMEM tables to 1-D to avoid (8,128)-word SMEM padding.
    w1, b1 = _fold_bn(p["w1"], p["b1"], p["bn1_g"], p["bn1_b"],
                      p["bn1_m"], p["bn1_v"])
    w2, b2 = _fold_bn(p["w2"], p["b2"], p["bn2_g"], p["bn2_b"],
                      p["bn2_m"], p["bn2_v"])
    w3, b3 = _fold_bn(p["w3"], p["b3"], p["bn3_g"], p["bn3_b"],
                      p["bn3_m"], p["bn3_v"])
    w1 = jnp.transpose(w1, (1, 0)).ravel()   # (c_mid*c1,)  [co*c1 + ci]
    w2 = jnp.transpose(w2, (1, 0)).ravel()   # (c_mid*k*k,) [c*k*k + dy*k + dx]
    w3 = jnp.transpose(w3, (1, 0)).ravel()   # (c2*c_mid,)  [co*c_mid + ci]

    # ---- lane packing: b_pack images side-by-side on the lane axis ---------
    # (wrapper-side reshape/transpose = layout plumbing; the kernel then works
    # on ~128 useful lanes per op with unmasked output stores)
    b_pack = max(1, min(n, _LANES // w))
    n_pad = (-n) % b_pack
    if n_pad:
        x_nchw = jnp.concatenate(
            [x_nchw, jnp.zeros((n_pad, c1, h, w), x_nchw.dtype)], axis=0)
    nb = (n + n_pad) // b_pack
    xp = (x_nchw.reshape(nb, b_pack, c1, h, w)
                 .transpose(0, 2, 3, 1, 4)
                 .reshape(nb, c1, h, b_pack * w))

    kernel = functools.partial(_fused_ib_kernel, k=k, c1=c1, c_mid=c_mid,
                               c2=c2, h=h, w=w, b_pack=b_pack)
    smem = pl.BlockSpec(memory_space=pltpu.MemorySpace.SMEM)

    # TODO(synk): for large feature maps, add a second grid axis tiling H with
    # a k//2 row halo so the per-step VMEM footprint stays bounded on v7x
    # (64 MiB VMEM) while keeping lane-dense W blocks.
    out_p = pl.pallas_call(
        kernel,
        out_shape=jax.ShapeDtypeStruct((nb, c2, h, b_pack * w), x_nchw.dtype),
        grid=(nb,),
        in_specs=[
            pl.BlockSpec((1, c1, h, b_pack * w), lambda i: (i, 0, 0, 0)),
            smem, smem, smem, smem, smem, smem,
        ],
        out_specs=pl.BlockSpec((1, c2, h, b_pack * w), lambda i: (i, 0, 0, 0)),
        compiler_params=pltpu.CompilerParams(
            dimension_semantics=("parallel",),
        ),
    )(xp, w1, b1, w2, b2, w3, b3)

    out = (out_p.reshape(nb, c2, h, b_pack, w)
                 .transpose(0, 3, 1, 2, 4)
                 .reshape(nb * b_pack, c2, h, w))
    return out[:n]


# ----------------------------------------------------------------------------
# Pure-JAX reference (lax conv, NCHW) mirroring the PyTorch module + init.
# ----------------------------------------------------------------------------
def reference_forward(x_nchw, p, *, k=3, stride=1, eps=BN_EPS):
    def bn(x, g, b, m, v):
        return ((x - m[None, :, None, None])
                / jnp.sqrt(v[None, :, None, None] + eps)
                * g[None, :, None, None] + b[None, :, None, None])

    def silu(x):
        return x * jax.nn.sigmoid(x)

    c_mid = p["w1"].shape[1]
    dn = ("NCHW", "OIHW", "NCHW")

    w1 = jnp.transpose(p["w1"], (1, 0))[:, :, None, None]
    y = jax.lax.conv_general_dilated(x_nchw, w1, (1, 1), "VALID",
                                     dimension_numbers=dn)
    y = y + p["b1"][None, :, None, None]
    y = silu(bn(y, p["bn1_g"], p["bn1_b"], p["bn1_m"], p["bn1_v"]))

    w2 = jnp.transpose(p["w2"].reshape(k, k, c_mid), (2, 0, 1))[:, None, :, :]
    pad = k // 2
    y = jax.lax.conv_general_dilated(y, w2, (stride, stride),
                                     ((pad, pad), (pad, pad)),
                                     dimension_numbers=dn,
                                     feature_group_count=c_mid)
    y = y + p["b2"][None, :, None, None]
    y = silu(bn(y, p["bn2_g"], p["bn2_b"], p["bn2_m"], p["bn2_v"]))

    w3 = jnp.transpose(p["w3"], (1, 0))[:, :, None, None]
    z = jax.lax.conv_general_dilated(y, w3, (1, 1), "VALID",
                                     dimension_numbers=dn)
    z = z + p["b3"][None, :, None, None]
    z = bn(z, p["bn3_g"], p["bn3_b"], p["bn3_m"], p["bn3_v"])
    return z


def init_params(key, c1, c2, c_mid, k):
    keys = jax.random.split(key, 9)
    p = {
        "w1": jax.random.normal(keys[0], (c1, c_mid), jnp.float32) * 0.3,
        "b1": jax.random.normal(keys[1], (c_mid,), jnp.float32) * 0.1,
        "w2": jax.random.normal(keys[2], (k * k, c_mid), jnp.float32) * 0.3,
        "b2": jax.random.normal(keys[3], (c_mid,), jnp.float32) * 0.1,
        "w3": jax.random.normal(keys[4], (c_mid, c2), jnp.float32) * 0.3,
        "b3": jax.random.normal(keys[5], (c2,), jnp.float32) * 0.1,
    }
    for i, (name, c) in enumerate([("bn1", c_mid), ("bn2", c_mid), ("bn3", c2)]):
        kg, kb, km, kv = jax.random.split(keys[6 + i], 4)
        p[name + "_g"] = 1.0 + 0.1 * jax.random.normal(kg, (c,), jnp.float32)
        p[name + "_b"] = 0.1 * jax.random.normal(kb, (c,), jnp.float32)
        p[name + "_m"] = 0.1 * jax.random.normal(km, (c,), jnp.float32)
        p[name + "_v"] = 0.5 + jax.random.uniform(kv, (c,), jnp.float32)
    return p


if __name__ == "__main__":
    key = jax.random.PRNGKey(0)
    kx, kp = jax.random.split(key)

    # 16 images of 4x16x16 -> lane-packed 8 per slab (8*16 = 128 lanes), 2 grid
    # steps (keeps both v7x TensorCores busy under dimension_semantics).
    N, C1, H, W = 16, 4, 16, 16      # input (NCHW)
    C2, K, STRIDE = 8, 3, 1          # InvertedBottleneck(c1=4, c2=8, k=3)
    C_MID = C1                       # e=None -> c_mid = c1

    x = jax.random.normal(kx, (N, C1, H, W), jnp.float32)
    params = init_params(kp, C1, C2, C_MID, K)

    out = inverted_bottleneck_forward(x, params, k=K, stride=STRIDE)
    out = jax.block_until_ready(out)
    assert out.shape == (N, C2, H, W)

    ref = reference_forward(x, params, k=K, stride=STRIDE)
    # 2e-4: tiny extra slack for the EUP approx-reciprocal + Newton SiLU path.
    np.testing.assert_allclose(np.asarray(out), np.asarray(ref),
                               atol=2e-4, rtol=2e-4)
    print("KERNEL_OK")
</pallas_src>

<mosaic_0001>
module attributes {stable_mosaic.version = 11 : i64} {
  func.func @_fused_ib_kernel(%arg0: i32, %arg1: memref<1x4x16x128xf32, #tpu.memory_space<vmem>>, %arg2: memref<16xf32, #tpu.memory_space<smem>>, %arg3: memref<4xf32, #tpu.memory_space<smem>>, %arg4: memref<36xf32, #tpu.memory_space<smem>>, %arg5: memref<4xf32, #tpu.memory_space<smem>>, %arg6: memref<32xf32, #tpu.memory_space<smem>>, %arg7: memref<8xf32, #tpu.memory_space<smem>>, %arg8: memref<1x8x16x128xf32, #tpu.memory_space<vmem>>) attributes {dimension_semantics = [#tpu.dimension_semantics<parallel>], iteration_bounds = array<i64: 2>, scalar_prefetch = 0 : i64, scratch_operands = 0 : i64, tpu.core_type = #tpu.core_type<tc>, window_params = [{transform_indices = @transform_0, window_bounds = array<i64: 1, 4, 16, 128>}, {transform_indices = @transform_1, window_bounds = array<i64: 16>}, {transform_indices = @transform_2, window_bounds = array<i64: 4>}, {transform_indices = @transform_3, window_bounds = array<i64: 36>}, {transform_indices = @transform_4, window_bounds = array<i64: 4>}, {transform_indices = @transform_5, window_bounds = array<i64: 32>}, {transform_indices = @transform_6, window_bounds = array<i64: 8>}, {transform_indices = @transform_7, window_bounds = array<i64: 1, 8, 16, 128>}]} {
    %0 = tpu.iota {dimensions = array<i32: 1>} : vector<16x128xi32>
    %1 = tpu.iota {dimensions = array<i32: 0>} : vector<16x128xi32>
    %c15_i32 = arith.constant 15 : i32
    %2 = vector.broadcast %c15_i32 : i32 to vector<16x128xi32>
    %3 = arith.andi %0, %2 : vector<16x128xi32>
    %c1_i32 = arith.constant 1 : i32
    %4 = vector.broadcast %c1_i32 : i32 to vector<16x128xi32>
    %5 = arith.cmpi sge, %3, %4 : vector<16x128xi32>
    %c1_i32_0 = arith.constant 1 : i32
    %6 = vector.broadcast %c1_i32_0 : i32 to vector<16x128xi32>
    %7 = arith.cmpi sge, %1, %6 : vector<16x128xi32>
    %c15_i32_1 = arith.constant 15 : i32
    %8 = vector.broadcast %c15_i32_1 : i32 to vector<16x128xi32>
    %9 = arith.cmpi slt, %3, %8 : vector<16x128xi32>
    %c15_i32_2 = arith.constant 15 : i32
    %10 = vector.broadcast %c15_i32_2 : i32 to vector<16x128xi32>
    %11 = arith.cmpi slt, %1, %10 : vector<16x128xi32>
    %c0 = arith.constant 0 : index
    %c0_3 = arith.constant 0 : index
    %c0_4 = arith.constant 0 : index
    %c0_5 = arith.constant 0 : index
    %12 = vector.load %arg1[%c0, %c0_3, %c0_4, %c0_5] : memref<1x4x16x128xf32, #tpu.memory_space<vmem>>, vector<1x1x16x128xf32>
    %13 = vector.shape_cast %12 : vector<1x1x16x128xf32> to vector<16x128xf32>
    %c0_6 = arith.constant 0 : index
    %c1 = arith.constant 1 : index
    %c0_7 = arith.constant 0 : index
    %c0_8 = arith.constant 0 : index
    %14 = vector.load %arg1[%c0_6, %c1, %c0_7, %c0_8] : memref<1x4x16x128xf32, #tpu.memory_space<vmem>>, vector<1x1x16x128xf32>
    %15 = vector.shape_cast %14 : vector<1x1x16x128xf32> to vector<16x128xf32>
    %c0_9 = arith.constant 0 : index
    %c2 = arith.constant 2 : index
    %c0_10 = arith.constant 0 : index
    %c0_11 = arith.constant 0 : index
    %16 = vector.load %arg1[%c0_9, %c2, %c0_10, %c0_11] : memref<1x4x16x128xf32, #tpu.memory_space<vmem>>, vector<1x1x16x128xf32>
    %17 = vector.shape_cast %16 : vector<1x1x16x128xf32> to vector<16x128xf32>
    %c0_12 = arith.constant 0 : index
    %c3 = arith.constant 3 : index
    %c0_13 = arith.constant 0 : index
    %c0_14 = arith.constant 0 : index
    %18 = vector.load %arg1[%c0_12, %c3, %c0_13, %c0_14] : memref<1x4x16x128xf32, #tpu.memory_space<vmem>>, vector<1x1x16x128xf32>
    %19 = vector.shape_cast %18 : vector<1x1x16x128xf32> to vector<16x128xf32>
    %c0_15 = arith.constant 0 : index
    %20 = memref.load %arg2[%c0_15] : memref<16xf32, #tpu.memory_space<smem>>
    %21 = vector.broadcast %20 : f32 to vector<16x128xf32>
    %22 = arith.mulf %13, %21 : vector<16x128xf32>
    %c1_16 = arith.constant 1 : index
    %23 = memref.load %arg2[%c1_16] : memref<16xf32, #tpu.memory_space<smem>>
    %24 = vector.broadcast %23 : f32 to vector<16x128xf32>
    %25 = arith.mulf %15, %24 : vector<16x128xf32>
    %26 = arith.addf %22, %25 : vector<16x128xf32>
    %c2_17 = arith.constant 2 : index
    %27 = memref.load %arg2[%c2_17] : memref<16xf32, #tpu.memory_space<smem>>
    %28 = vector.broadcast %27 : f32 to vector<16x128xf32>
    %29 = arith.mulf %17, %28 : vector<16x128xf32>
    %30 = arith.addf %26, %29 : vector<16x128xf32>
    %c3_18 = arith.constant 3 : index
    %31 = memref.load %arg2[%c3_18] : memref<16xf32, #tpu.memory_space<smem>>
    %32 = vector.broadcast %31 : f32 to vector<16x128xf32>
    %33 = arith.mulf %19, %32 : vector<16x128xf32>
    %34 = arith.addf %30, %33 : vector<16x128xf32>
    %c0_19 = arith.constant 0 : index
    %35 = memref.load %arg3[%c0_19] : memref<4xf32, #tpu.memory_space<smem>>
    %36 = vector.broadcast %35 : f32 to vector<16x128xf32>
    %37 = arith.addf %34, %36 : vector<16x128xf32>
    %cst = arith.constant 0.000000e+00 : f32
    %38 = vector.broadcast %cst : f32 to vector<16x128xf32>
    %39 = arith.subf %38, %37 : vector<16x128xf32>
    %40 = math.exp %39 : vector<16x128xf32>
    %cst_20 = arith.constant 1.000000e+00 : f32
    %41 = vector.broadcast %cst_20 : f32 to vector<16x128xf32>
    %42 = arith.addf %41, %40 : vector<16x128xf32>
    %43 = tpu.reciprocal %42 {approx = true} : vector<16x128xf32> -> vector<16x128xf32>
    %44 = arith.mulf %42, %43 : vector<16x128xf32>
    %cst_21 = arith.constant 2.000000e+00 : f32
    %45 = vector.broadcast %cst_21 : f32 to vector<16x128xf32>
    %46 = arith.subf %45, %44 : vector<16x128xf32>
    %47 = arith.mulf %43, %46 : vector<16x128xf32>
    %48 = arith.mulf %37, %47 : vector<16x128xf32>
    %c4 = arith.constant 4 : index
    %49 = memref.load %arg2[%c4] : memref<16xf32, #tpu.memory_space<smem>>
    %50 = vector.broadcast %49 : f32 to vector<16x128xf32>
    %51 = arith.mulf %13, %50 : vector<16x128xf32>
    %c5 = arith.constant 5 : index
    %52 = memref.load %arg2[%c5] : memref<16xf32, #tpu.memory_space<smem>>
    %53 = vector.broadcast %52 : f32 to vector<16x128xf32>
    %54 = arith.mulf %15, %53 : vector<16x128xf32>
    %55 = arith.addf %51, %54 : vector<16x128xf32>
    %c6 = arith.constant 6 : index
    %56 = memref.load %arg2[%c6] : memref<16xf32, #tpu.memory_space<smem>>
    %57 = vector.broadcast %56 : f32 to vector<16x128xf32>
    %58 = arith.mulf %17, %57 : vector<16x128xf32>
    %59 = arith.addf %55, %58 : vector<16x128xf32>
    %c7 = arith.constant 7 : index
    %60 = memref.load %arg2[%c7] : memref<16xf32, #tpu.memory_space<smem>>
    %61 = vector.broadcast %60 : f32 to vector<16x128xf32>
    %62 = arith.mulf %19, %61 : vector<16x128xf32>
    %63 = arith.addf %59, %62 : vector<16x128xf32>
    %c1_22 = arith.constant 1 : index
    %64 = memref.load %arg3[%c1_22] : memref<4xf32, #tpu.memory_space<smem>>
    %65 = vector.broadcast %64 : f32 to vector<16x128xf32>
    %66 = arith.addf %63, %65 : vector<16x128xf32>
    %cst_23 = arith.constant 0.000000e+00 : f32
    %67 = vector.broadcast %cst_23 : f32 to vector<16x128xf32>
    %68 = arith.subf %67, %66 : vector<16x128xf32>
    %69 = math.exp %68 : vector<16x128xf32>
    %cst_24 = arith.constant 1.000000e+00 : f32
    %70 = vector.broadcast %cst_24 : f32 to vector<16x128xf32>
    %71 = arith.addf %70, %69 : vector<16x128xf32>
    %72 = tpu.reciprocal %71 {approx = true} : vector<16x128xf32> -> vector<16x128xf32>
    %73 = arith.mulf %71, %72 : vector<16x128xf32>
    %cst_25 = arith.constant 2.000000e+00 : f32
    %74 = vector.broadcast %cst_25 : f32 to vector<16x128xf32>
    %75 = arith.subf %74, %73 : vector<16x128xf32>
    %76 = arith.mulf %72, %75 : vector<16x128xf32>
    %77 = arith.mulf %66, %76 : vector<16x128xf32>
    %c8 = arith.constant 8 : index
    %78 = memref.load %arg2[%c8] : memref<16xf32, #tpu.memory_space<smem>>
    %79 = vector.broadcast %78 : f32 to vector<16x128xf32>
    %80 = arith.mulf %13, %79 : vector<16x128xf32>
    %c9 = arith.constant 9 : index
    %81 = memref.load %arg2[%c9] : memref<16xf32, #tpu.memory_space<smem>>
    %82 = vector.broadcast %81 : f32 to vector<16x128xf32>
    %83 = arith.mulf %15, %82 : vector<16x128xf32>
    %84 = arith.addf %80, %83 : vector<16x128xf32>
    %c10 = arith.constant 10 : index
    %85 = memref.load %arg2[%c10] : memref<16xf32, #tpu.memory_space<smem>>
    %86 = vector.broadcast %85 : f32 to vector<16x128xf32>
    %87 = arith.mulf %17, %86 : vector<16x128xf32>
    %88 = arith.addf %84, %87 : vector<16x128xf32>
    %c11 = arith.constant 11 : index
    %89 = memref.load %arg2[%c11] : memref<16xf32, #tpu.memory_space<smem>>
    %90 = vector.broadcast %89 : f32 to vector<16x128xf32>
    %91 = arith.mulf %19, %90 : vector<16x128xf32>
    %92 = arith.addf %88, %91 : vector<16x128xf32>
    %c2_26 = arith.constant 2 : index
    %93 = memref.load %arg3[%c2_26] : memref<4xf32, #tpu.memory_space<smem>>
    %94 = vector.broadcast %93 : f32 to vector<16x128xf32>
    %95 = arith.addf %92, %94 : vector<16x128xf32>
    %cst_27 = arith.constant 0.000000e+00 : f32
    %96 = vector.broadcast %cst_27 : f32 to vector<16x128xf32>
    %97 = arith.subf %96, %95 : vector<16x128xf32>
    %98 = math.exp %97 : vector<16x128xf32>
    %cst_28 = arith.constant 1.000000e+00 : f32
    %99 = vector.broadcast %cst_28 : f32 to vector<16x128xf32>
    %100 = arith.addf %99, %98 : vector<16x128xf32>
    %101 = tpu.reciprocal %100 {approx = true} : vector<16x128xf32> -> vector<16x128xf32>
    %102 = arith.mulf %100, %101 : vector<16x128xf32>
    %cst_29 = arith.constant 2.000000e+00 : f32
    %103 = vector.broadcast %cst_29 : f32 to vector<16x128xf32>
    %104 = arith.subf %103, %102 : vector<16x128xf32>
    %105 = arith.mulf %101, %104 : vector<16x128xf32>
    %106 = arith.mulf %95, %105 : vector<16x128xf32>
    %c12 = arith.constant 12 : index
    %107 = memref.load %arg2[%c12] : memref<16xf32, #tpu.memory_space<smem>>
    %108 = vector.broadcast %107 : f32 to vector<16x128xf32>
    %109 = arith.mulf %13, %108 : vector<16x128xf32>
    %c13 = arith.constant 13 : index
    %110 = memref.load %arg2[%c13] : memref<16xf32, #tpu.memory_space<smem>>
    %111 = vector.broadcast %110 : f32 to vector<16x128xf32>
    %112 = arith.mulf %15, %111 : vector<16x128xf32>
    %113 = arith.addf %109, %112 : vector<16x128xf32>
    %c14 = arith.constant 14 : index
    %114 = memref.load %arg2[%c14] : memref<16xf32, #tpu.memory_space<smem>>
    %115 = vector.broadcast %114 : f32 to vector<16x128xf32>
    %116 = arith.mulf %17, %115 : vector<16x128xf32>
    %117 = arith.addf %113, %116 : vector<16x128xf32>
    %c15 = arith.constant 15 : index
    %118 = memref.load %arg2[%c15] : memref<16xf32, #tpu.memory_space<smem>>
    %119 = vector.broadcast %118 : f32 to vector<16x128xf32>
    %120 = arith.mulf %19, %119 : vector<16x128xf32>
    %121 = arith.addf %117, %120 : vector<16x128xf32>
    %c3_30 = arith.constant 3 : index
    %122 = memref.load %arg3[%c3_30] : memref<4xf32, #tpu.memory_space<smem>>
    %123 = vector.broadcast %122 : f32 to vector<16x128xf32>
    %124 = arith.addf %121, %123 : vector<16x128xf32>
    %cst_31 = arith.constant 0.000000e+00 : f32
    %125 = vector.broadcast %cst_31 : f32 to vector<16x128xf32>
    %126 = arith.subf %125, %124 : vector<16x128xf32>
    %127 = math.exp %126 : vector<16x128xf32>
    %cst_32 = arith.constant 1.000000e+00 : f32
    %128 = vector.broadcast %cst_32 : f32 to vector<16x128xf32>
    %129 = arith.addf %128, %127 : vector<16x128xf32>
    %130 = tpu.reciprocal %129 {approx = true} : vector<16x128xf32> -> vector<16x128xf32>
    %131 = arith.mulf %129, %130 : vector<16x128xf32>
    %cst_33 = arith.constant 2.000000e+00 : f32
    %132 = vector.broadcast %cst_33 : f32 to vector<16x128xf32>
    %133 = arith.subf %132, %131 : vector<16x128xf32>
    %134 = arith.mulf %130, %133 : vector<16x128xf32>
    %135 = arith.mulf %124, %134 : vector<16x128xf32>
    %c1_i32_34 = arith.constant 1 : i32
    %136 = tpu.dynamic_rotate %48 by %c1_i32_34 dim 1 : vector<16x128xf32>, i32 -> vector<16x128xf32>
    %cst_35 = arith.constant 0.000000e+00 : f32
    %137 = vector.broadcast %cst_35 : f32 to vector<16x128xf32>
    %138 = arith.select %5, %136, %137 : vector<16x128xi1>, vector<16x128xf32>
    %c127_i32 = arith.constant 127 : i32
    %139 = tpu.dynamic_rotate %48 by %c127_i32 dim 1 : vector<16x128xf32>, i32 -> vector<16x128xf32>
    %cst_36 = arith.constant 0.000000e+00 : f32
    %140 = vector.broadcast %cst_36 : f32 to vector<16x128xf32>
    %141 = arith.select %9, %139, %140 : vector<16x128xi1>, vector<16x128xf32>
    %c0_37 = arith.constant 0 : index
    %142 = memref.load %arg4[%c0_37] : memref<36xf32, #tpu.memory_space<smem>>
    %143 = vector.broadcast %142 : f32 to vector<16x128xf32>
    %144 = arith.mulf %138, %143 : vector<16x128xf32>
    %c1_38 = arith.constant 1 : index
    %145 = memref.load %arg4[%c1_38] : memref<36xf32, #tpu.memory_space<smem>>
    %146 = vector.broadcast %145 : f32 to vector<16x128xf32>
    %147 = arith.mulf %48, %146 : vector<16x128xf32>
    %148 = arith.addf %144, %147 : vector<16x128xf32>
    %c2_39 = arith.constant 2 : index
    %149 = memref.load %arg4[%c2_39] : memref<36xf32, #tpu.memory_space<smem>>
    %150 = vector.broadcast %149 : f32 to vector<16x128xf32>
    %151 = arith.mulf %141, %150 : vector<16x128xf32>
    %152 = arith.addf %148, %151 : vector<16x128xf32>
    %c1_i32_40 = arith.constant 1 : i32
    %153 = tpu.dynamic_rotate %152 by %c1_i32_40 dim 0 : vector<16x128xf32>, i32 -> vector<16x128xf32>
    %cst_41 = arith.constant 0.000000e+00 : f32
    %154 = vector.broadcast %cst_41 : f32 to vector<16x128xf32>
    %155 = arith.select %7, %153, %154 : vector<16x128xi1>, vector<16x128xf32>
    %c3_42 = arith.constant 3 : index
    %156 = memref.load %arg4[%c3_42] : memref<36xf32, #tpu.memory_space<smem>>
    %157 = vector.broadcast %156 : f32 to vector<16x128xf32>
    %158 = arith.mulf %138, %157 : vector<16x128xf32>
    %c4_43 = arith.constant 4 : index
    %159 = memref.load %arg4[%c4_43] : memref<36xf32, #tpu.memory_space<smem>>
    %160 = vector.broadcast %159 : f32 to vector<16x128xf32>
    %161 = arith.mulf %48, %160 : vector<16x128xf32>
    %162 = arith.addf %158, %161 : vector<16x128xf32>
    %c5_44 = arith.constant 5 : index
    %163 = memref.load %arg4[%c5_44] : memref<36xf32, #tpu.memory_space<smem>>
    %164 = vector.broadcast %163 : f32 to vector<16x128xf32>
    %165 = arith.mulf %141, %164 : vector<16x128xf32>
    %166 = arith.addf %162, %165 : vector<16x128xf32>
    %167 = arith.addf %155, %166 : vector<16x128xf32>
    %c6_45 = arith.constant 6 : index
    %168 = memref.load %arg4[%c6_45] : memref<36xf32, #tpu.memory_space<smem>>
    %169 = vector.broadcast %168 : f32 to vector<16x128xf32>
    %170 = arith.mulf %138, %169 : vector<16x128xf32>
    %c7_46 = arith.constant 7 : index
    %171 = memref.load %arg4[%c7_46] : memref<36xf32, #tpu.memory_space<smem>>
    %172 = vector.broadcast %171 : f32 to vector<16x128xf32>
    %173 = arith.mulf %48, %172 : vector<16x128xf32>
    %174 = arith.addf %170, %173 : vector<16x128xf32>
    %c8_47 = arith.constant 8 : index
    %175 = memref.load %arg4[%c8_47] : memref<36xf32, #tpu.memory_space<smem>>
    %176 = vector.broadcast %175 : f32 to vector<16x128xf32>
    %177 = arith.mulf %141, %176 : vector<16x128xf32>
    %178 = arith.addf %174, %177 : vector<16x128xf32>
    %c15_i32_48 = arith.constant 15 : i32
    %179 = tpu.dynamic_rotate %178 by %c15_i32_48 dim 0 : vector<16x128xf32>, i32 -> vector<16x128xf32>
    %cst_49 = arith.constant 0.000000e+00 : f32
    %180 = vector.broadcast %cst_49 : f32 to vector<16x128xf32>
    %181 = arith.select %11, %179, %180 : vector<16x128xi1>, vector<16x128xf32>
    %182 = arith.addf %167, %181 : vector<16x128xf32>
    %c0_50 = arith.constant 0 : index
    %183 = memref.load %arg5[%c0_50] : memref<4xf32, #tpu.memory_space<smem>>
    %184 = vector.broadcast %183 : f32 to vector<16x128xf32>
    %185 = arith.addf %182, %184 : vector<16x128xf32>
    %cst_51 = arith.constant 0.000000e+00 : f32
    %186 = vector.broadcast %cst_51 : f32 to vector<16x128xf32>
    %187 = arith.subf %186, %185 : vector<16x128xf32>
    %188 = math.exp %187 : vector<16x128xf32>
    %cst_52 = arith.constant 1.000000e+00 : f32
    %189 = vector.broadcast %cst_52 : f32 to vector<16x128xf32>
    %190 = arith.addf %189, %188 : vector<16x128xf32>
    %191 = tpu.reciprocal %190 {approx = true} : vector<16x128xf32> -> vector<16x128xf32>
    %192 = arith.mulf %190, %191 : vector<16x128xf32>
    %cst_53 = arith.constant 2.000000e+00 : f32
    %193 = vector.broadcast %cst_53 : f32 to vector<16x128xf32>
    %194 = arith.subf %193, %192 : vector<16x128xf32>
    %195 = arith.mulf %191, %194 : vector<16x128xf32>
    %196 = arith.mulf %185, %195 : vector<16x128xf32>
    %c1_i32_54 = arith.constant 1 : i32
    %197 = tpu.dynamic_rotate %77 by %c1_i32_54 dim 1 : vector<16x128xf32>, i32 -> vector<16x128xf32>
    %cst_55 = arith.constant 0.000000e+00 : f32
    %198 = vector.broadcast %cst_55 : f32 to vector<16x128xf32>
    %199 = arith.select %5, %197, %198 : vector<16x128xi1>, vector<16x128xf32>
    %c127_i32_56 = arith.constant 127 : i32
    %200 = tpu.dynamic_rotate %77 by %c127_i32_56 dim 1 : vector<16x128xf32>, i32 -> vector<16x128xf32>
    %cst_57 = arith.constant 0.000000e+00 : f32
    %201 = vector.broadcast %cst_57 : f32 to vector<16x128xf32>
    %202 = arith.select %9, %200, %201 : vector<16x128xi1>, vector<16x128xf32>
    %c9_58 = arith.constant 9 : index
    %203 = memref.load %arg4[%c9_58] : memref<36xf32, #tpu.memory_space<smem>>
    %204 = vector.broadcast %203 : f32 to vector<16x128xf32>
    %205 = arith.mulf %199, %204 : vector<16x128xf32>
    %c10_59 = arith.constant 10 : index
    %206 = memref.load %arg4[%c10_59] : memref<36xf32, #tpu.memory_space<smem>>
    %207 = vector.broadcast %206 : f32 to vector<16x128xf32>
    %208 = arith.mulf %77, %207 : vector<16x128xf32>
    %209 = arith.addf %205, %208 : vector<16x128xf32>
    %c11_60 = arith.constant 11 : index
    %210 = memref.load %arg4[%c11_60] : memref<36xf32, #tpu.memory_space<smem>>
    %211 = vector.broadcast %210 : f32 to vector<16x128xf32>
    %212 = arith.mulf %202, %211 : vector<16x128xf32>
    %213 = arith.addf %209, %212 : vector<16x128xf32>
    %c1_i32_61 = arith.constant 1 : i32
    %214 = tpu.dynamic_rotate %213 by %c1_i32_61 dim 0 : vector<16x128xf32>, i32 -> vector<16x128xf32>
    %cst_62 = arith.constant 0.000000e+00 : f32
    %215 = vector.broadcast %cst_62 : f32 to vector<16x128xf32>
    %216 = arith.select %7, %214, %215 : vector<16x128xi1>, vector<16x128xf32>
    %c12_63 = arith.constant 12 : index
    %217 = memref.load %arg4[%c12_63] : memref<36xf32, #tpu.memory_space<smem>>
    %218 = vector.broadcast %217 : f32 to vector<16x128xf32>
    %219 = arith.mulf %199, %218 : vector<16x128xf32>
    %c13_64 = arith.constant 13 : index
    %220 = memref.load %arg4[%c13_64] : memref<36xf32, #tpu.memory_space<smem>>
    %221 = vector.broadcast %220 : f32 to vector<16x128xf32>
    %222 = arith.mulf %77, %221 : vector<16x128xf32>
    %223 = arith.addf %219, %222 : vector<16x128xf32>
    %c14_65 = arith.constant 14 : index
    %224 = memref.load %arg4[%c14_65] : memref<36xf32, #tpu.memory_space<smem>>
    %225 = vector.broadcast %224 : f32 to vector<16x128xf32>
    %226 = arith.mulf %202, %225 : vector<16x128xf32>
    %227 = arith.addf %223, %226 : vector<16x128xf32>
    %228 = arith.addf %216, %227 : vector<16x128xf32>
    %c15_66 = arith.constant 15 : index
    %229 = memref.load %arg4[%c15_66] : memref<36xf32, #tpu.memory_space<smem>>
    %230 = vector.broadcast %229 : f32 to vector<16x128xf32>
    %231 = arith.mulf %199, %230 : vector<16x128xf32>
    %c16 = arith.constant 16 : index
    %232 = memref.load %arg4[%c16] : memref<36xf32, #tpu.memory_space<smem>>
    %233 = vector.broadcast %232 : f32 to vector<16x128xf32>
    %234 = arith.mulf %77, %233 : vector<16x128xf32>
    %235 = arith.addf %231, %234 : vector<16x128xf32>
    %c17 = arith.constant 17 : index
    %236 = memref.load %arg4[%c17] : memref<36xf32, #tpu.memory_space<smem>>
    %237 = vector.broadcast %236 : f32 to vector<16x128xf32>
    %238 = arith.mulf %202, %237 : vector<16x128xf32>
    %239 = arith.addf %235, %238 : vector<16x128xf32>
    %c15_i32_67 = arith.constant 15 : i32
    %240 = tpu.dynamic_rotate %239 by %c15_i32_67 dim 0 : vector<16x128xf32>, i32 -> vector<16x128xf32>
    %cst_68 = arith.constant 0.000000e+00 : f32
    %241 = vector.broadcast %cst_68 : f32 to vector<16x128xf32>
    %242 = arith.select %11, %240, %241 : vector<16x128xi1>, vector<16x128xf32>
    %243 = arith.addf %228, %242 : vector<16x128xf32>
    %c1_69 = arith.constant 1 : index
    %244 = memref.load %arg5[%c1_69] : memref<4xf32, #tpu.memory_space<smem>>
    %245 = vector.broadcast %244 : f32 to vector<16x128xf32>
    %246 = arith.addf %243, %245 : vector<16x128xf32>
    %cst_70 = arith.constant 0.000000e+00 : f32
    %247 = vector.broadcast %cst_70 : f32 to vector<16x128xf32>
    %248 = arith.subf %247, %246 : vector<16x128xf32>
    %249 = math.exp %248 : vector<16x128xf32>
    %cst_71 = arith.constant 1.000000e+00 : f32
    %250 = vector.broadcast %cst_71 : f32 to vector<16x128xf32>
    %251 = arith.addf %250, %249 : vector<16x128xf32>
    %252 = tpu.reciprocal %251 {approx = true} : vector<16x128xf32> -> vector<16x128xf32>
    %253 = arith.mulf %251, %252 : vector<16x128xf32>
    %cst_72 = arith.constant 2.000000e+00 : f32
    %254 = vector.broadcast %cst_72 : f32 to vector<16x128xf32>
    %255 = arith.subf %254, %253 : vector<16x128xf32>
    %256 = arith.mulf %252, %255 : vector<16x128xf32>
    %257 = arith.mulf %246, %256 : vector<16x128xf32>
    %c1_i32_73 = arith.constant 1 : i32
    %258 = tpu.dynamic_rotate %106 by %c1_i32_73 dim 1 : vector<16x128xf32>, i32 -> vector<16x128xf32>
    %cst_74 = arith.constant 0.000000e+00 : f32
    %259 = vector.broadcast %cst_74 : f32 to vector<16x128xf32>
    %260 = arith.select %5, %258, %259 : vector<16x128xi1>, vector<16x128xf32>
    %c127_i32_75 = arith.constant 127 : i32
    %261 = tpu.dynamic_rotate %106 by %c127_i32_75 dim 1 : vector<16x128xf32>, i32 -> vector<16x128xf32>
    %cst_76 = arith.constant 0.000000e+00 : f32
    %262 = vector.broadcast %cst_76 : f32 to vector<16x128xf32>
    %263 = arith.select %9, %261, %262 : vector<16x128xi1>, vector<16x128xf32>
    %c18 = arith.constant 18 : index
    %264 = memref.load %arg4[%c18] : memref<36xf32, #tpu.memory_space<smem>>
    %265 = vector.broadcast %264 : f32 to vector<16x128xf32>
    %266 = arith.mulf %260, %265 : vector<16x128xf32>
    %c19 = arith.constant 19 : index
    %267 = memref.load %arg4[%c19] : memref<36xf32, #tpu.memory_space<smem>>
    %268 = vector.broadcast %267 : f32 to vector<16x128xf32>
    %269 = arith.mulf %106, %268 : vector<16x128xf32>
    %270 = arith.addf %266, %269 : vector<16x128xf32>
    %c20 = arith.constant 20 : index
    %271 = memref.load %arg4[%c20] : memref<36xf32, #tpu.memory_space<smem>>
    %272 = vector.broadcast %271 : f32 to vector<16x128xf32>
    %273 = arith.mulf %263, %272 : vector<16x128xf32>
    %274 = arith.addf %270, %273 : vector<16x128xf32>
    %c1_i32_77 = arith.constant 1 : i32
    %275 = tpu.dynamic_rotate %274 by %c1_i32_77 dim 0 : vector<16x128xf32>, i32 -> vector<16x128xf32>
    %cst_78 = arith.constant 0.000000e+00 : f32
    %276 = vector.broadcast %cst_78 : f32 to vector<16x128xf32>
    %277 = arith.select %7, %275, %276 : vector<16x128xi1>, vector<16x128xf32>
    %c21 = arith.constant 21 : index
    %278 = memref.load %arg4[%c21] : memref<36xf32, #tpu.memory_space<smem>>
    %279 = vector.broadcast %278 : f32 to vector<16x128xf32>
    %280 = arith.mulf %260, %279 : vector<16x128xf32>
    %c22 = arith.constant 22 : index
    %281 = memref.load %arg4[%c22] : memref<36xf32, #tpu.memory_space<smem>>
    %282 = vector.broadcast %281 : f32 to vector<16x128xf32>
    %283 = arith.mulf %106, %282 : vector<16x128xf32>
    %284 = arith.addf %280, %283 : vector<16x128xf32>
    %c23 = arith.constant 23 : index
    %285 = memref.load %arg4[%c23] : memref<36xf32, #tpu.memory_space<smem>>
    %286 = vector.broadcast %285 : f32 to vector<16x128xf32>
    %287 = arith.mulf %263, %286 : vector<16x128xf32>
    %288 = arith.addf %284, %287 : vector<16x128xf32>
    %289 = arith.addf %277, %288 : vector<16x128xf32>
    %c24 = arith.constant 24 : index
    %290 = memref.load %arg4[%c24] : memref<36xf32, #tpu.memory_space<smem>>
    %291 = vector.broadcast %290 : f32 to vector<16x128xf32>
    %292 = arith.mulf %260, %291 : vector<16x128xf32>
    %c25 = arith.constant 25 : index
    %293 = memref.load %arg4[%c25] : memref<36xf32, #tpu.memory_space<smem>>
    %294 = vector.broadcast %293 : f32 to vector<16x128xf32>
    %295 = arith.mulf %106, %294 : vector<16x128xf32>
    %296 = arith.addf %292, %295 : vector<16x128xf32>
    %c26 = arith.constant 26 : index
    %297 = memref.load %arg4[%c26] : memref<36xf32, #tpu.memory_space<smem>>
    %298 = vector.broadcast %297 : f32 to vector<16x128xf32>
    %299 = arith.mulf %263, %298 : vector<16x128xf32>
    %300 = arith.addf %296, %299 : vector<16x128xf32>
    %c15_i32_79 = arith.constant 15 : i32
    %301 = tpu.dynamic_rotate %300 by %c15_i32_79 dim 0 : vector<16x128xf32>, i32 -> vector<16x128xf32>
    %cst_80 = arith.constant 0.000000e+00 : f32
    %302 = vector.broadcast %cst_80 : f32 to vector<16x128xf32>
    %303 = arith.select %11, %301, %302 : vector<16x128xi1>, vector<16x128xf32>
    %304 = arith.addf %289, %303 : vector<16x128xf32>
    %c2_81 = arith.constant 2 : index
    %305 = memref.load %arg5[%c2_81] : memref<4xf32, #tpu.memory_space<smem>>
    %306 = vector.broadcast %305 : f32 to vector<16x128xf32>
    %307 = arith.addf %304, %306 : vector<16x128xf32>
    %cst_82 = arith.constant 0.000000e+00 : f32
    %308 = vector.broadcast %cst_82 : f32 to vector<16x128xf32>
    %309 = arith.subf %308, %307 : vector<16x128xf32>
    %310 = math.exp %309 : vector<16x128xf32>
    %cst_83 = arith.constant 1.000000e+00 : f32
    %311 = vector.broadcast %cst_83 : f32 to vector<16x128xf32>
    %312 = arith.addf %311, %310 : vector<16x128xf32>
    %313 = tpu.reciprocal %312 {approx = true} : vector<16x128xf32> -> vector<16x128xf32>
    %314 = arith.mulf %312, %313 : vector<16x128xf32>
    %cst_84 = arith.constant 2.000000e+00 : f32
    %315 = vector.broadcast %cst_84 : f32 to vector<16x128xf32>
    %316 = arith.subf %315, %314 : vector<16x128xf32>
    %317 = arith.mulf %313, %316 : vector<16x128xf32>
    %318 = arith.mulf %307, %317 : vector<16x128xf32>
    %c1_i32_85 = arith.constant 1 : i32
    %319 = tpu.dynamic_rotate %135 by %c1_i32_85 dim 1 : vector<16x128xf32>, i32 -> vector<16x128xf32>
    %cst_86 = arith.constant 0.000000e+00 : f32
    %320 = vector.broadcast %cst_86 : f32 to vector<16x128xf32>
    %321 = arith.select %5, %319, %320 : vector<16x128xi1>, vector<16x128xf32>
    %c127_i32_87 = arith.constant 127 : i32
    %322 = tpu.dynamic_rotate %135 by %c127_i32_87 dim 1 : vector<16x128xf32>, i32 -> vector<16x128xf32>
    %cst_88 = arith.constant 0.000000e+00 : f32
    %323 = vector.broadcast %cst_88 : f32 to vector<16x128xf32>
    %324 = arith.select %9, %322, %323 : vector<16x128xi1>, vector<16x128xf32>
    %c27 = arith.constant 27 : index
    %325 = memref.load %arg4[%c27] : memref<36xf32, #tpu.memory_space<smem>>
    %326 = vector.broadcast %325 : f32 to vector<16x128xf32>
    %327 = arith.mulf %321, %326 : vector<16x128xf32>
    %c28 = arith.constant 28 : index
    %328 = memref.load %arg4[%c28] : memref<36xf32, #tpu.memory_space<smem>>
    %329 = vector.broadcast %328 : f32 to vector<16x128xf32>
    %330 = arith.mulf %135, %329 : vector<16x128xf32>
    %331 = arith.addf %327, %330 : vector<16x128xf32>
    %c29 = arith.constant 29 : index
    %332 = memref.load %arg4[%c29] : memref<36xf32, #tpu.memory_space<smem>>
    %333 = vector.broadcast %332 : f32 to vector<16x128xf32>
    %334 = arith.mulf %324, %333 : vector<16x128xf32>
    %335 = arith.addf %331, %334 : vector<16x128xf32>
    %c1_i32_89 = arith.constant 1 : i32
    %336 = tpu.dynamic_rotate %335 by %c1_i32_89 dim 0 : vector<16x128xf32>, i32 -> vector<16x128xf32>
    %cst_90 = arith.constant 0.000000e+00 : f32
    %337 = vector.broadcast %cst_90 : f32 to vector<16x128xf32>
    %338 = arith.select %7, %336, %337 : vector<16x128xi1>, vector<16x128xf32>
    %c30 = arith.constant 30 : index
    %339 = memref.load %arg4[%c30] : memref<36xf32, #tpu.memory_space<smem>>
    %340 = vector.broadcast %339 : f32 to vector<16x128xf32>
    %341 = arith.mulf %321, %340 : vector<16x128xf32>
    %c31 = arith.constant 31 : index
    %342 = memref.load %arg4[%c31] : memref<36xf32, #tpu.memory_space<smem>>
    %343 = vector.broadcast %342 : f32 to vector<16x128xf32>
    %344 = arith.mulf %135, %343 : vector<16x128xf32>
    %345 = arith.addf %341, %344 : vector<16x128xf32>
    %c32 = arith.constant 32 : index
    %346 = memref.load %arg4[%c32] : memref<36xf32, #tpu.memory_space<smem>>
    %347 = vector.broadcast %346 : f32 to vector<16x128xf32>
    %348 = arith.mulf %324, %347 : vector<16x128xf32>
    %349 = arith.addf %345, %348 : vector<16x128xf32>
    %350 = arith.addf %338, %349 : vector<16x128xf32>
    %c33 = arith.constant 33 : index
    %351 = memref.load %arg4[%c33] : memref<36xf32, #tpu.memory_space<smem>>
    %352 = vector.broadcast %351 : f32 to vector<16x128xf32>
    %353 = arith.mulf %321, %352 : vector<16x128xf32>
    %c34 = arith.constant 34 : index
    %354 = memref.load %arg4[%c34] : memref<36xf32, #tpu.memory_space<smem>>
    %355 = vector.broadcast %354 : f32 to vector<16x128xf32>
    %356 = arith.mulf %135, %355 : vector<16x128xf32>
    %357 = arith.addf %353, %356 : vector<16x128xf32>
    %c35 = arith.constant 35 : index
    %358 = memref.load %arg4[%c35] : memref<36xf32, #tpu.memory_space<smem>>
    %359 = vector.broadcast %358 : f32 to vector<16x128xf32>
    %360 = arith.mulf %324, %359 : vector<16x128xf32>
    %361 = arith.addf %357, %360 : vector<16x128xf32>
    %c15_i32_91 = arith.constant 15 : i32
    %362 = tpu.dynamic_rotate %361 by %c15_i32_91 dim 0 : vector<16x128xf32>, i32 -> vector<16x128xf32>
    %cst_92 = arith.constant 0.000000e+00 : f32
    %363 = vector.broadcast %cst_92 : f32 to vector<16x128xf32>
    %364 = arith.select %11, %362, %363 : vector<16x128xi1>, vector<16x128xf32>
    %365 = arith.addf %350, %364 : vector<16x128xf32>
    %c3_93 = arith.constant 3 : index
    %366 = memref.load %arg5[%c3_93] : memref<4xf32, #tpu.memory_space<smem>>
    %367 = vector.broadcast %366 : f32 to vector<16x128xf32>
    %368 = arith.addf %365, %367 : vector<16x128xf32>
    %cst_94 = arith.constant 0.000000e+00 : f32
    %369 = vector.broadcast %cst_94 : f32 to vector<16x128xf32>
    %370 = arith.subf %369, %368 : vector<16x128xf32>
    %371 = math.exp %370 : vector<16x128xf32>
    %cst_95 = arith.constant 1.000000e+00 : f32
    %372 = vector.broadcast %cst_95 : f32 to vector<16x128xf32>
    %373 = arith.addf %372, %371 : vector<16x128xf32>
    %374 = tpu.reciprocal %373 {approx = true} : vector<16x128xf32> -> vector<16x128xf32>
    %375 = arith.mulf %373, %374 : vector<16x128xf32>
    %cst_96 = arith.constant 2.000000e+00 : f32
    %376 = vector.broadcast %cst_96 : f32 to vector<16x128xf32>
    %377 = arith.subf %376, %375 : vector<16x128xf32>
    %378 = arith.mulf %374, %377 : vector<16x128xf32>
    %379 = arith.mulf %368, %378 : vector<16x128xf32>
    %c0_97 = arith.constant 0 : index
    %380 = memref.load %arg6[%c0_97] : memref<32xf32, #tpu.memory_space<smem>>
    %381 = vector.broadcast %380 : f32 to vector<16x128xf32>
    %382 = arith.mulf %196, %381 : vector<16x128xf32>
    %c1_98 = arith.constant 1 : index
    %383 = memref.load %arg6[%c1_98] : memref<32xf32, #tpu.memory_space<smem>>
    %384 = vector.broadcast %383 : f32 to vector<16x128xf32>
    %385 = arith.mulf %257, %384 : vector<16x128xf32>
    %386 = arith.addf %382, %385 : vector<16x128xf32>
    %c2_99 = arith.constant 2 : index
    %387 = memref.load %arg6[%c2_99] : memref<32xf32, #tpu.memory_space<smem>>
    %388 = vector.broadcast %387 : f32 to vector<16x128xf32>
    %389 = arith.mulf %318, %388 : vector<16x128xf32>
    %390 = arith.addf %386, %389 : vector<16x128xf32>
    %c3_100 = arith.constant 3 : index
    %391 = memref.load %arg6[%c3_100] : memref<32xf32, #tpu.memory_space<smem>>
    %392 = vector.broadcast %391 : f32 to vector<16x128xf32>
    %393 = arith.mulf %379, %392 : vector<16x128xf32>
    %394 = arith.addf %390, %393 : vector<16x128xf32>
    %c0_101 = arith.constant 0 : index
    %395 = memref.load %arg7[%c0_101] : memref<8xf32, #tpu.memory_space<smem>>
    %396 = vector.broadcast %395 : f32 to vector<16x128xf32>
    %397 = arith.addf %394, %396 : vector<16x128xf32>
    %c0_102 = arith.constant 0 : index
    %c0_103 = arith.constant 0 : index
    %c0_104 = arith.constant 0 : index
    %c0_105 = arith.constant 0 : index
    %398 = vector.load %arg8[%c0_102, %c0_103, %c0_104, %c0_105] : memref<1x8x16x128xf32, #tpu.memory_space<vmem>>, vector<1x1x16x128xf32>
    %399 = vector.shape_cast %398 : vector<1x1x16x128xf32> to vector<16x128xf32>
    %400 = vector.shape_cast %397 : vector<16x128xf32> to vector<1x1x16x128xf32>
    tpu.vector_store %arg8[%c0_102, %c0_103, %c0_104, %c0_105], %400 {strides = array<i32>} : memref<1x8x16x128xf32, #tpu.memory_space<vmem>>, vector<1x1x16x128xf32>,
    %c4_106 = arith.constant 4 : index
    %401 = memref.load %arg6[%c4_106] : memref<32xf32, #tpu.memory_space<smem>>
    %402 = vector.broadcast %401 : f32 to vector<16x128xf32>
    %403 = arith.mulf %196, %402 : vector<16x128xf32>
    %c5_107 = arith.constant 5 : index
    %404 = memref.load %arg6[%c5_107] : memref<32xf32, #tpu.memory_space<smem>>
    %405 = vector.broadcast %404 : f32 to vector<16x128xf32>
    %406 = arith.mulf %257, %405 : vector<16x128xf32>
    %407 = arith.addf %403, %406 : vector<16x128xf32>
    %c6_108 = arith.constant 6 : index
    %408 = memref.load %arg6[%c6_108] : memref<32xf32, #tpu.memory_space<smem>>
    %409 = vector.broadcast %408 : f32 to vector<16x128xf32>
    %410 = arith.mulf %318, %409 : vector<16x128xf32>
    %411 = arith.addf %407, %410 : vector<16x128xf32>
    %c7_109 = arith.constant 7 : index
    %412 = memref.load %arg6[%c7_109] : memref<32xf32, #tpu.memory_space<smem>>
    %413 = vector.broadcast %412 : f32 to vector<16x128xf32>
    %414 = arith.mulf %379, %413 : vector<16x128xf32>
    %415 = arith.addf %411, %414 : vector<16x128xf32>
    %c1_110 = arith.constant 1 : index
    %416 = memref.load %arg7[%c1_110] : memref<8xf32, #tpu.memory_space<smem>>
    %417 = vector.broadcast %416 : f32 to vector<16x128xf32>
    %418 = arith.addf %415, %417 : vector<16x128xf32>
    %c0_111 = arith.constant 0 : index
    %c1_112 = arith.constant 1 : index
    %c0_113 = arith.constant 0 : index
    %c0_114 = arith.constant 0 : index
    %419 = vector.load %arg8[%c0_111, %c1_112, %c0_113, %c0_114] : memref<1x8x16x128xf32, #tpu.memory_space<vmem>>, vector<1x1x16x128xf32>
    %420 = vector.shape_cast %419 : vector<1x1x16x128xf32> to vector<16x128xf32>
    %421 = vector.shape_cast %418 : vector<16x128xf32> to vector<1x1x16x128xf32>
    tpu.vector_store %arg8[%c0_111, %c1_112, %c0_113, %c0_114], %421 {strides = array<i32>} : memref<1x8x16x128xf32, #tpu.memory_space<vmem>>, vector<1x1x16x128xf32>,
    %c8_115 = arith.constant 8 : index
    %422 = memref.load %arg6[%c8_115] : memref<32xf32, #tpu.memory_space<smem>>
    %423 = vector.broadcast %422 : f32 to vector<16x128xf32>
    %424 = arith.mulf %196, %423 : vector<16x128xf32>
    %c9_116 = arith.constant 9 : index
    %425 = memref.load %arg6[%c9_116] : memref<32xf32, #tpu.memory_space<smem>>
    %426 = vector.broadcast %425 : f32 to vector<16x128xf32>
    %427 = arith.mulf %257, %426 : vector<16x128xf32>
    %428 = arith.addf %424, %427 : vector<16x128xf32>
    %c10_117 = arith.constant 10 : index
    %429 = memref.load %arg6[%c10_117] : memref<32xf32, #tpu.memory_space<smem>>
    %430 = vector.broadcast %429 : f32 to vector<16x128xf32>
    %431 = arith.mulf %318, %430 : vector<16x128xf32>
    %432 = arith.addf %428, %431 : vector<16x128xf32>
    %c11_118 = arith.constant 11 : index
    %433 = memref.load %arg6[%c11_118] : memref<32xf32, #tpu.memory_space<smem>>
    %434 = vector.broadcast %433 : f32 to vector<16x128xf32>
    %435 = arith.mulf %379, %434 : vector<16x128xf32>
    %436 = arith.addf %432, %435 : vector<16x128xf32>
    %c2_119 = arith.constant 2 : index
    %437 = memref.load %arg7[%c2_119] : memref<8xf32, #tpu.memory_space<smem>>
    %438 = vector.broadcast %437 : f32 to vector<16x128xf32>
    %439 = arith.addf %436, %438 : vector<16x128xf32>
    %c0_120 = arith.constant 0 : index
    %c2_121 = arith.constant 2 : index
    %c0_122 = arith.constant 0 : index
    %c0_123 = arith.constant 0 : index
    %440 = vector.load %arg8[%c0_120, %c2_121, %c0_122, %c0_123] : memref<1x8x16x128xf32, #tpu.memory_space<vmem>>, vector<1x1x16x128xf32>
    %441 = vector.shape_cast %440 : vector<1x1x16x128xf32> to vector<16x128xf32>
    %442 = vector.shape_cast %439 : vector<16x128xf32> to vector<1x1x16x128xf32>
    tpu.vector_store %arg8[%c0_120, %c2_121, %c0_122, %c0_123], %442 {strides = array<i32>} : memref<1x8x16x128xf32, #tpu.memory_space<vmem>>, vector<1x1x16x128xf32>,
    %c12_124 = arith.constant 12 : index
    %443 = memref.load %arg6[%c12_124] : memref<32xf32, #tpu.memory_space<smem>>
    %444 = vector.broadcast %443 : f32 to vector<16x128xf32>
    %445 = arith.mulf %196, %444 : vector<16x128xf32>
    %c13_125 = arith.constant 13 : index
    %446 = memref.load %arg6[%c13_125] : memref<32xf32, #tpu.memory_space<smem>>
    %447 = vector.broadcast %446 : f32 to vector<16x128xf32>
    %448 = arith.mulf %257, %447 : vector<16x128xf32>
    %449 = arith.addf %445, %448 : vector<16x128xf32>
    %c14_126 = arith.constant 14 : index
    %450 = memref.load %arg6[%c14_126] : memref<32xf32, #tpu.memory_space<smem>>
    %451 = vector.broadcast %450 : f32 to vector<16x128xf32>
    %452 = arith.mulf %318, %451 : vector<16x128xf32>
    %453 = arith.addf %449, %452 : vector<16x128xf32>
    %c15_127 = arith.constant 15 : index
    %454 = memref.load %arg6[%c15_127] : memref<32xf32, #tpu.memory_space<smem>>
    %455 = vector.broadcast %454 : f32 to vector<16x128xf32>
    %456 = arith.mulf %379, %455 : vector<16x128xf32>
    %457 = arith.addf %453, %456 : vector<16x128xf32>
    %c3_128 = arith.constant 3 : index
    %458 = memref.load %arg7[%c3_128] : memref<8xf32, #tpu.memory_space<smem>>
    %459 = vector.broadcast %458 : f32 to vector<16x128xf32>
    %460 = arith.addf %457, %459 : vector<16x128xf32>
    %c0_129 = arith.constant 0 : index
    %c3_130 = arith.constant 3 : index
    %c0_131 = arith.constant 0 : index
    %c0_132 = arith.constant 0 : index
    %461 = vector.load %arg8[%c0_129, %c3_130, %c0_131, %c0_132] : memref<1x8x16x128xf32, #tpu.memory_space<vmem>>, vector<1x1x16x128xf32>
    %462 = vector.shape_cast %461 : vector<1x1x16x128xf32> to vector<16x128xf32>
    %463 = vector.shape_cast %460 : vector<16x128xf32> to vector<1x1x16x128xf32>
    tpu.vector_store %arg8[%c0_129, %c3_130, %c0_131, %c0_132], %463 {strides = array<i32>} : memref<1x8x16x128xf32, #tpu.memory_space<vmem>>, vector<1x1x16x128xf32>,
    %c16_133 = arith.constant 16 : index
    %464 = memref.load %arg6[%c16_133] : memref<32xf32, #tpu.memory_space<smem>>
    %465 = vector.broadcast %464 : f32 to vector<16x128xf32>
    %466 = arith.mulf %196, %465 : vector<16x128xf32>
    %c17_134 = arith.constant 17 : index
    %467 = memref.load %arg6[%c17_134] : memref<32xf32, #tpu.memory_space<smem>>
    %468 = vector.broadcast %467 : f32 to vector<16x128xf32>
    %469 = arith.mulf %257, %468 : vector<16x128xf32>
    %470 = arith.addf %466, %469 : vector<16x128xf32>
    %c18_135 = arith.constant 18 : index
    %471 = memref.load %arg6[%c18_135] : memref<32xf32, #tpu.memory_space<smem>>
    %472 = vector.broadcast %471 : f32 to vector<16x128xf32>
    %473 = arith.mulf %318, %472 : vector<16x128xf32>
    %474 = arith.addf %470, %473 : vector<16x128xf32>
    %c19_136 = arith.constant 19 : index
    %475 = memref.load %arg6[%c19_136] : memref<32xf32, #tpu.memory_space<smem>>
    %476 = vector.broadcast %475 : f32 to vector<16x128xf32>
    %477 = arith.mulf %379, %476 : vector<16x128xf32>
    %478 = arith.addf %474, %477 : vector<16x128xf32>
    %c4_137 = arith.constant 4 : index
    %479 = memref.load %arg7[%c4_137] : memref<8xf32, #tpu.memory_space<smem>>
    %480 = vector.broadcast %479 : f32 to vector<16x128xf32>
    %481 = arith.addf %478, %480 : vector<16x128xf32>
    %c0_138 = arith.constant 0 : index
    %c4_139 = arith.constant 4 : index
    %c0_140 = arith.constant 0 : index
    %c0_141 = arith.constant 0 : index
    %482 = vector.load %arg8[%c0_138, %c4_139, %c0_140, %c0_141] : memref<1x8x16x128xf32, #tpu.memory_space<vmem>>, vector<1x1x16x128xf32>
    %483 = vector.shape_cast %482 : vector<1x1x16x128xf32> to vector<16x128xf32>
    %484 = vector.shape_cast %481 : vector<16x128xf32> to vector<1x1x16x128xf32>
    tpu.vector_store %arg8[%c0_138, %c4_139, %c0_140, %c0_141], %484 {strides = array<i32>} : memref<1x8x16x128xf32, #tpu.memory_space<vmem>>, vector<1x1x16x128xf32>,
    %c20_142 = arith.constant 20 : index
    %485 = memref.load %arg6[%c20_142] : memref<32xf32, #tpu.memory_space<smem>>
    %486 = vector.broadcast %485 : f32 to vector<16x128xf32>
    %487 = arith.mulf %196, %486 : vector<16x128xf32>
    %c21_143 = arith.constant 21 : index
    %488 = memref.load %arg6[%c21_143] : memref<32xf32, #tpu.memory_space<smem>>
    %489 = vector.broadcast %488 : f32 to vector<16x128xf32>
    %490 = arith.mulf %257, %489 : vector<16x128xf32>
    %491 = arith.addf %487, %490 : vector<16x128xf32>
    %c22_144 = arith.constant 22 : index
    %492 = memref.load %arg6[%c22_144] : memref<32xf32, #tpu.memory_space<smem>>
    %493 = vector.broadcast %492 : f32 to vector<16x128xf32>
    %494 = arith.mulf %318, %493 : vector<16x128xf32>
    %495 = arith.addf %491, %494 : vector<16x128xf32>
    %c23_145 = arith.constant 23 : index
    %496 = memref.load %arg6[%c23_145] : memref<32xf32, #tpu.memory_space<smem>>
    %497 = vector.broadcast %496 : f32 to vector<16x128xf32>
    %498 = arith.mulf %379, %497 : vector<16x128xf32>
    %499 = arith.addf %495, %498 : vector<16x128xf32>
    %c5_146 = arith.constant 5 : index
    %500 = memref.load %arg7[%c5_146] : memref<8xf32, #tpu.memory_space<smem>>
    %501 = vector.broadcast %500 : f32 to vector<16x128xf32>
    %502 = arith.addf %499, %501 : vector<16x128xf32>
    %c0_147 = arith.constant 0 : index
    %c5_148 = arith.constant 5 : index
    %c0_149 = arith.constant 0 : index
    %c0_150 = arith.constant 0 : index
    %503 = vector.load %arg8[%c0_147, %c5_148, %c0_149, %c0_150] : memref<1x8x16x128xf32, #tpu.memory_space<vmem>>, vector<1x1x16x128xf32>
    %504 = vector.shape_cast %503 : vector<1x1x16x128xf32> to vector<16x128xf32>
    %505 = vector.shape_cast %502 : vector<16x128xf32> to vector<1x1x16x128xf32>
    tpu.vector_store %arg8[%c0_147, %c5_148, %c0_149, %c0_150], %505 {strides = array<i32>} : memref<1x8x16x128xf32, #tpu.memory_space<vmem>>, vector<1x1x16x128xf32>,
    %c24_151 = arith.constant 24 : index
    %506 = memref.load %arg6[%c24_151] : memref<32xf32, #tpu.memory_space<smem>>
    %507 = vector.broadcast %506 : f32 to vector<16x128xf32>
    %508 = arith.mulf %196, %507 : vector<16x128xf32>
    %c25_152 = arith.constant 25 : index
    %509 = memref.load %arg6[%c25_152] : memref<32xf32, #tpu.memory_space<smem>>
    %510 = vector.broadcast %509 : f32 to vector<16x128xf32>
    %511 = arith.mulf %257, %510 : vector<16x128xf32>
    %512 = arith.addf %508, %511 : vector<16x128xf32>
    %c26_153 = arith.constant 26 : index
    %513 = memref.load %arg6[%c26_153] : memref<32xf32, #tpu.memory_space<smem>>
    %514 = vector.broadcast %513 : f32 to vector<16x128xf32>
    %515 = arith.mulf %318, %514 : vector<16x128xf32>
    %516 = arith.addf %512, %515 : vector<16x128xf32>
    %c27_154 = arith.constant 27 : index
    %517 = memref.load %arg6[%c27_154] : memref<32xf32, #tpu.memory_space<smem>>
    %518 = vector.broadcast %517 : f32 to vector<16x128xf32>
    %519 = arith.mulf %379, %518 : vector<16x128xf32>
    %520 = arith.addf %516, %519 : vector<16x128xf32>
    %c6_155 = arith.constant 6 : index
    %521 = memref.load %arg7[%c6_155] : memref<8xf32, #tpu.memory_space<smem>>
    %522 = vector.broadcast %521 : f32 to vector<16x128xf32>
    %523 = arith.addf %520, %522 : vector<16x128xf32>
    %c0_156 = arith.constant 0 : index
    %c6_157 = arith.constant 6 : index
    %c0_158 = arith.constant 0 : index
    %c0_159 = arith.constant 0 : index
    %524 = vector.load %arg8[%c0_156, %c6_157, %c0_158, %c0_159] : memref<1x8x16x128xf32, #tpu.memory_space<vmem>>, vector<1x1x16x128xf32>
    %525 = vector.shape_cast %524 : vector<1x1x16x128xf32> to vector<16x128xf32>
    %526 = vector.shape_cast %523 : vector<16x128xf32> to vector<1x1x16x128xf32>
    tpu.vector_store %arg8[%c0_156, %c6_157, %c0_158, %c0_159], %526 {strides = array<i32>} : memref<1x8x16x128xf32, #tpu.memory_space<vmem>>, vector<1x1x16x128xf32>,
    %c28_160 = arith.constant 28 : index
    %527 = memref.load %arg6[%c28_160] : memref<32xf32, #tpu.memory_space<smem>>
    %528 = vector.broadcast %527 : f32 to vector<16x128xf32>
    %529 = arith.mulf %196, %528 : vector<16x128xf32>
    %c29_161 = arith.constant 29 : index
    %530 = memref.load %arg6[%c29_161] : memref<32xf32, #tpu.memory_space<smem>>
    %531 = vector.broadcast %530 : f32 to vector<16x128xf32>
    %532 = arith.mulf %257, %531 : vector<16x128xf32>
    %533 = arith.addf %529, %532 : vector<16x128xf32>
    %c30_162 = arith.constant 30 : index
    %534 = memref.load %arg6[%c30_162] : memref<32xf32, #tpu.memory_space<smem>>
    %535 = vector.broadcast %534 : f32 to vector<16x128xf32>
    %536 = arith.mulf %318, %535 : vector<16x128xf32>
    %537 = arith.addf %533, %536 : vector<16x128xf32>
    %c31_163 = arith.constant 31 : index
    %538 = memref.load %arg6[%c31_163] : memref<32xf32, #tpu.memory_space<smem>>
    %539 = vector.broadcast %538 : f32 to vector<16x128xf32>
    %540 = arith.mulf %379, %539 : vector<16x128xf32>
    %541 = arith.addf %537, %540 : vector<16x128xf32>
    %c7_164 = arith.constant 7 : index
    %542 = memref.load %arg7[%c7_164] : memref<8xf32, #tpu.memory_space<smem>>
    %543 = vector.broadcast %542 : f32 to vector<16x128xf32>
    %544 = arith.addf %541, %543 : vector<16x128xf32>
    %c0_165 = arith.constant 0 : index
    %c7_166 = arith.constant 7 : index
    %c0_167 = arith.constant 0 : index
    %c0_168 = arith.constant 0 : index
    %545 = vector.load %arg8[%c0_165, %c7_166, %c0_167, %c0_168] : memref<1x8x16x128xf32, #tpu.memory_space<vmem>>, vector<1x1x16x128xf32>
    %546 = vector.shape_cast %545 : vector<1x1x16x128xf32> to vector<16x128xf32>
    %547 = vector.shape_cast %544 : vector<16x128xf32> to vector<1x1x16x128xf32>
    tpu.vector_store %arg8[%c0_165, %c7_166, %c0_167, %c0_168], %547 {strides = array<i32>} : memref<1x8x16x128xf32, #tpu.memory_space<vmem>>, vector<1x1x16x128xf32>,
    return
  }
  func.func @transform_0(%arg0: i32) -> (i32, i32, i32, i32) {
    %c0_i32 = arith.constant 0 : i32
    %c0_i32_0 = arith.constant 0 : i32
    %c0_i32_1 = arith.constant 0 : i32
    %c0_i32_2 = arith.constant 0 : i32
    return %arg0, %c0_i32, %c0_i32_0, %c0_i32_1 : i32, i32, i32, i32
  }
  func.func @transform_1(%arg0: i32) -> i32 {
    %c0_i32 = arith.constant 0 : i32
    %c0_i32_0 = arith.constant 0 : i32
    return %c0_i32 : i32
  }
  func.func @transform_2(%arg0: i32) -> i32 {
    %c0_i32 = arith.constant 0 : i32
    %c0_i32_0 = arith.constant 0 : i32
    return %c0_i32 : i32
  }
  func.func @transform_3(%arg0: i32) -> i32 {
    %c0_i32 = arith.constant 0 : i32
    %c0_i32_0 = arith.constant 0 : i32
    return %c0_i32 : i32
  }
  func.func @transform_4(%arg0: i32) -> i32 {
    %c0_i32 = arith.constant 0 : i32
    %c0_i32_0 = arith.constant 0 : i32
    return %c0_i32 : i32
  }
  func.func @transform_5(%arg0: i32) -> i32 {
    %c0_i32 = arith.constant 0 : i32
    %c0_i32_0 = arith.constant 0 : i32
    return %c0_i32 : i32
  }
  func.func @transform_6(%arg0: i32) -> i32 {
    %c0_i32 = arith.constant 0 : i32
    %c0_i32_0 = arith.constant 0 : i32
    return %c0_i32 : i32
  }
  func.func @transform_7(%arg0: i32) -> (i32, i32, i32, i32) {
    %c0_i32 = arith.constant 0 : i32
    %c0_i32_0 = arith.constant 0 : i32
    %c0_i32_1 = arith.constant 0 : i32
    %c0_i32_2 = arith.constant 0 : i32
    return %arg0, %c0_i32, %c0_i32_0, %c0_i32_1 : i32, i32, i32, i32
  }
}

</mosaic_0001>

<bundles_post_ra>
// kernel: tpu_custom_call.1
= control target key start
LH: loop header
LB: loop body
LE: loop exit
PB: predicated region body
PF: predicated region fallthrough
CT: control target
= control target key end

     0   :  { %s3045_s0 = inlined_call_operand.hbm [shape: f32[2,4,16,128], index: 0, kind: input, shape index: {}]   ;;  %s3046_s1 = inlined_call_operand.vmem [shape: f32[16], index: 1, kind: input, shape index: {}]   ;;  %s3047_s2 = inlined_call_operand.vmem [shape: f32[4], index: 2, kind: input, shape index: {}]   ;;  %s3048_s3 = inlined_call_operand.vmem [shape: f32[36], index: 3, kind: input, shape index: {}]   ;;  %s3049_s4 = inlined_call_operand.vmem [shape: f32[4], index: 4, kind: input, shape index: {}]   ;;  %s3050_s5 = inlined_call_operand.vmem [shape: f32[32], index: 5, kind: input, shape index: {}]   ;;  %s3051_s6 = inlined_call_operand.vmem [shape: f32[8], index: 6, kind: input, shape index: {}]   ;;  %s3052_s7 = inlined_call_operand.hbm [shape: f32[2,8,16,128], index: 7, kind: output, shape index: {}]  }
   0x1   :  { %3070 = sst [smem:[#allocation32_spill]] %s3045_s0 }
   0x2   :  { %3071 = sst [smem:[#allocation33_spill]] %s3046_s1 }
   0x3   :  { %3072 = sst [smem:[#allocation34_spill]] %s3047_s2 }
   0x4   :  { %3073 = sst [smem:[#allocation35_spill]] %s3048_s3 }
   0x5   :  { %3074 = sst [smem:[#allocation36_spill]] %s3049_s4 }
   0x6   :  { %3075 = sst [smem:[#allocation37_spill]] %s3050_s5 }
   0x7   :  { %3076 = sst [smem:[#allocation38_spill]] %s3051_s6 }
   0x8   :  { %3077 = sst [smem:[#allocation39_spill]] %s3052_s7 }
   0x9   :  { %12 = vsyncpa [#allocation3], 0 }
   0xa   :  { %14 = vsyncpa [#allocation3 + $0x1], 0 }
   0xb   :  { %15 = vsyncpa [#allocation5], 0 }
   0xc   :  { %16 = vsyncpa [#allocation8], 0 }
   0xd   :  { %17 = vsyncpa [#allocation11], 0 }
   0xe   :  { %18 = vsyncpa [#allocation14], 0 }
   0xf   :  { %19 = vsyncpa [#allocation4], 0 }
  0x10   :  { %21 = vsyncpa [#allocation4 + $0x1], 0  ;;  %s1918_s24 = smov 0   ;;  %s1920_s25 = smov 0  }
  0x11   :  { %s1922_s26 = smov 0   ;;  %s1924_s27 = smov 0  }
  0x12 LB: > { %3078 = sst [smem:[#allocation22_spill]] %s1850_s24  ;;  %s1942_s8 = sadd.s32 4294967295, %s1862_s27   ;;  %s1862_s27 = sphi %s1924_s27, %s3136_s27   ;;  %s1858_s26 = sphi %s1922_s26, %s3139_s26   ;;  %s1854_s25 = sphi %s1920_s25, %s3138_s25   ;;  %s1850_s24 = sphi %s1918_s24, %s3137_s24  }
  0x13   : > { %3079 = sst [smem:[#allocation23_spill]] %s1854_s25  ;;  %p1346_p0 = scmp.ge.s32.totalorder %s1862_s27, 1 }
  0x14   : > { %3080 = sst [smem:[#allocation24_spill]] %s1858_s26  ;;  %p3053_p1 = scmp.eq.s32.totalorder %s1942_s8, 0 }
  0x15   : > { %3081 = sst [smem:[#allocation25_spill]] %s1862_s27  ;;  %p210_p2 = scmp.lt.s32.totalorder %s1862_s27, 3 }
  0x16   : > { %s3082_s2 = sld [smem:[#allocation34_spill]] }
  0x17   : > { %3083 = sst [smem:[#allocation26_spill]] %s1942_s8  ;;  %p1947_p3 = pnand %p1346_p0, %p210_p2 }
  0x18   : > { %s3085_s4 = sld [smem:[#allocation36_spill]] }
  0x19   : > { %s3084_s9 = scalar_select %p1947_p3, 1, 0 }
  0x1a   : > { %p1515_p5 = pneg %p1947_p3  ;;  %s3086_s1 = sld [smem:[#allocation33_spill]] }
  0x1b   : > { %s3088_s3 = sld [smem:[#allocation35_spill]] }
  0x1c   : > { %s234_s30 = sshll.u32 %s3082_s2, 4  ;;  %p1962_p6 = pnand %p1515_p5, %p3053_p1  ;;  %s235_s30 = int_to_ptr.vmem [resolvable:$true] %s234_s30 }
  0x1d   : > { %s1664_s20 = scalar_lea.vmem %s235_s30, 16  ;;  %p1672_p11 = scmp.lt.s32.totalorder %s235_s30, %s235_s30 }
  0x1e   : > { %s256_s12 = sshll.u32 %s3085_s4, 4  ;;  %p1665_p7 = scmp.ne.s32.totalorder %s235_s30, %s1664_s20  ;;  %s257_s12 = int_to_ptr.vmem [resolvable:$true] %s256_s12 }
  0x1f   : > { %p1975_p8 = pneg %p1962_p6  ;;  %p1673_p12 = scmp.lt.s32.totalorder %s1664_s20, %s1664_s20 }
  0x20   : > { %s223_s15 = sshll.u32 %s3086_s1, 4  ;;  %s1966_s15 = int_to_ptr.vmem [resolvable:$true] %s223_s15 }
  0x21   : > { %s245_s19 = sshll.u32 %s3088_s3, 4  ;;  %p1667_p9 = pnand %p1975_p8, %p1665_p7  ;;  %s1971_s19 = int_to_ptr.vmem [resolvable:$true] %s245_s19 }
  0x22   : > { %p1674_p13 = por %p1673_p12, %p1672_p11 }
  0x23   : > { %p1668_p10 = pneg %p1667_p9 }
  0x25   : > { %p1675_p0 = pnand %p1674_p13, %p1668_p10 }
  0x27   : > { %1678 = shalt.err (!%p1675_p0)
}
  0x28   : > { %s1864_s22 = smov [#allocation7]   ;;  %s1679_s23 = scalar_lea.vmem %s257_s12, 16 }
  0x29   : > { %1521 = dma.vmem_to_smem (!%p1962_p6), %s235_s30, 16, %s1864_s22, [#allocation8]  }
  0x2a   : > { %p1680_p2 = scmp.ne.s32.totalorder %s257_s12, %s1679_s23  ;;  %p1687_p1 = scmp.lt.s32.totalorder %s257_s12, %s257_s12 }
  0x2b   : > { %p1688_p3 = scmp.lt.s32.totalorder %s1679_s23, %s1679_s23 }
  0x2c   : > { %p1682_p5 = pnand %p1680_p2, %p1975_p8 }
  0x2d   : > { %p1689_p7 = por %p1688_p3, %p1687_p1 }
  0x2e   : > { %p1683_p4 = pneg %p1682_p5 }
  0x30   : > { %p1690_p9 = pnand %p1689_p7, %p1683_p4 }
  0x32   : > { %1693 = shalt.err (!%p1690_p9)
}
  0x33   : > { %s1865_s28 = smov [#allocation10]   ;;  %s1694_s29 = scalar_lea.vmem %s1966_s15, 16 }
  0x34   : > { %1527 = dma.vmem_to_smem (!%p1962_p6), %s257_s12, 16, %s1865_s28, [#allocation11]  }
  0x35   : > { %p1695_p10 = scmp.ne.s32.totalorder %s1966_s15, %s1694_s29  ;;  %p1702_p13 = scmp.lt.s32.totalorder %s1966_s15, %s1966_s15 }
  0x36   : > { %p1703_p0 = scmp.lt.s32.totalorder %s1694_s29, %s1694_s29 }
  0x37   : > { %p1697_p11 = pnand %p1695_p10, %p1975_p8 }
  0x38   : > { %p1704_p2 = por %p1703_p0, %p1702_p13 }
  0x39   : > { %p1698_p12 = pneg %p1697_p11 }
  0x3b   : > { %p1705_p1 = pnand %p1704_p2, %p1698_p12 }
  0x3d   : > { %1708 = shalt.err (!%p1705_p1)
}
  0x3e   : > { %s1866_s30 = smov [#allocation6]   ;;  %s1709_s10 = scalar_lea.vmem %s1971_s19, 16 }
  0x3f   : > { %1518 = dma.vmem_to_smem (!%p1962_p6), %s1966_s15, 16, %s1866_s30, [#allocation5]  }
  0x40   : > { %p1710_p3 = scmp.ne.s32.totalorder %s1971_s19, %s1709_s10  ;;  %p1717_p7 = scmp.lt.s32.totalorder %s1971_s19, %s1971_s19 }
  0x41   : > { %p1718_p9 = scmp.lt.s32.totalorder %s1709_s10, %s1709_s10 }
  0x42   : > { %p1712_p4 = pnand %p1710_p3, %p1975_p8 }
  0x43   : > { %p1719_p10 = por %p1718_p9, %p1717_p7 }
  0x44   : > { %p1713_p5 = pneg %p1712_p4 }
  0x46   : > { %p1720_p11 = pnand %p1719_p10, %p1713_p5 }
  0x48   : > { %1723 = shalt.err (!%p1720_p11)
}
  0x49   : > { %s1867_s11 = smov [#allocation9]   ;;  %s3090_s5 = sld [smem:[#allocation37_spill]] }
  0x4a   : > { %1524 = dma.vmem_to_smem (!%p1962_p6), %s1971_s19, 16, %s1867_s11, [#allocation8]  }
  0x4b   : > { %s3091_s6 = sld [smem:[#allocation38_spill]] }
  0x4f   : > { %s267_s14 = sshll.u32 %s3090_s5, 4  ;;  %s268_s14 = int_to_ptr.vmem [resolvable:$true] %s267_s14 }
  0x50   : > { %s1724_s20 = scalar_lea.vmem %s268_s14, 16  ;;  %p1732_p2 = scmp.lt.s32.totalorder %s268_s14, %s268_s14 }
  0x51   : > { %s278_s18 = sshll.u32 %s3091_s6, 4  ;;  %p1725_p12 = scmp.ne.s32.totalorder %s268_s14, %s1724_s20  ;;  %s279_s18 = int_to_ptr.vmem [resolvable:$true] %s278_s18 }
  0x52   : > { %p1733_p1 = scmp.lt.s32.totalorder %s1724_s20, %s1724_s20 }
  0x53   : > { %p1727_p13 = pnand %p1725_p12, %p1975_p8 }
  0x54   : > { %p1734_p3 = por %p1733_p1, %p1732_p2 }
  0x55   : > { %p1728_p0 = pneg %p1727_p13 }
  0x57   : > { %p1735_p4 = pnand %p1734_p3, %p1728_p0 }
  0x59   : > { %1738 = shalt.err (!%p1735_p4)
}
  0x5a   : > { %s1868_s19 = smov [#allocation12]   ;;  %s1739_s22 = scalar_lea.vmem %s279_s18, 16 }
  0x5b   : > { %1530 = dma.vmem_to_smem (!%p1962_p6), %s268_s14, 16, %s1868_s19, [#allocation11]  }
  0x5c   : > { %p1740_p5 = scmp.ne.s32.totalorder %s279_s18, %s1739_s22  ;;  %p1747_p10 = scmp.lt.s32.totalorder %s279_s18, %s279_s18 }
  0x5d   : > { %p1748_p11 = scmp.lt.s32.totalorder %s1739_s22, %s1739_s22 }
  0x5e   : > { %p1742_p7 = pnand %p1740_p5, %p1975_p8 }
  0x5f   : > { %p1749_p12 = por %p1748_p11, %p1747_p10 }
  0x60   : > { %p1743_p9 = pneg %p1742_p7 }
  0x62   : > { %p1750_p13 = pnand %p1749_p12, %p1743_p9 }
  0x64   : > { %1753 = shalt.err (!%p1750_p13)
}
  0x65   : > { %s1869_s23 = smov [#allocation13]   ;;  %s1345_s21 = sadd.s32 4294967294, %s1862_s27  }
  0x66   : > { %1533 = dma.vmem_to_smem (!%p1962_p6), %s279_s18, 16, %s1869_s23, [#allocation14]  }
  0x67   : > { %s2021_s28 = sadd.s32 1, %s1862_s27   ;;  %s34_s29 = sadd.s32 1, %s1858_s26 }
  0x68   : > { %3092 = sst [smem:[#allocation27_spill]] %s2021_s28  ;;  %s31_s16 = ssub.s32 %s1862_s27, %s2021_s28 }
  0x69   : > { %p32_p8 = scmp.eq.s32.totalorder %s31_s16, 0  ;;  %p41_p0 = scmp.ne.s32.totalorder %s1858_s26, %s1854_s25 }
  0x6a   : > { %p42_p2 = scmp.eq.s32.totalorder %s1862_s27, 0  ;;  %p47_p1 = scmp.ne.s32.totalorder %s1854_s25, %s1850_s24 }
  0x6b   : > { %s2032_s30 = scalar_select %p32_p8, %s1858_s26, %s34_s29  }
  0x6c   : > { %p2034_p3 = por %p42_p2, %p41_p0  ;;  %p3095_p4 = scmp.eq.s32.totalorder %s1942_s8, 0 }
  0x6d   : > { %3093 = sst [smem:[#allocation28_spill]] %s2032_s30  ;;  %p197_p5 = scmp.eq.s32.totalorder %s1942_s8, 1 }
  0x6e   : > { %p2040_p6 = por %p3095_p4, %p47_p1  ;;  %p203_p7 = scmp.eq.s32.totalorder %s1345_s21, 1 }
  0x6f   : > { %p1548_p9 = scmp.lt.s32.totalorder %s1862_s27, 2  ;;  %s289_s12 = sand.u32 1, %s1858_s26  }
  0x70   : > { %s3096_s11 = scalar_select %p2040_p6, 1, 0 }
  0x71   : > { %p2047_p10 = por %p197_p5, %p41_p0  ;;  %p2051_p11 = por %p203_p7, %p47_p1 }
  0x72   : > { %s1354_s15 = sshll.u32 %s289_s12, 6  ;;  %s1485_s17 = sshll.u32 %s1862_s27, 10 }
  0x73   : > { %s3097_s13 = scalar_select %p2047_p10, 1, 0 }
  0x74   : > { %s3099_s14 = scalar_select %p2051_p11, 1, 0 }
  0x75   : > { %3098 = sst [smem:[#allocation29_spill]] %s3097_s13  ;;  %s293_s22 = scalar_lea.vmem [#allocation2], %s1354_s15 }
  0x76   : > { %3100 = sst [smem:[#allocation30_spill]] %s3099_s14  ;;  %s300_s23 = sshll.u32 %s293_s22, 4  ;;  %s2061_s23 = int_to_ptr.vmem [resolvable:$true] %s300_s23 }
  0x77   : > { %s3101_s0 = sld [smem:[#allocation32_spill]]  ;;  %p2065_p12 = pnand %p1548_p9, %p2034_p3 }
  0x78   : > { %s2069_s16 = scalar_lea.sflag [#allocation3], %s289_s12 }
  0x79   : > { %p1756_p8 = pneg %p2065_p12 }
  0x7d   : > { %s2059_s19 = scalar_lea.hbm %s3101_s0, %s1485_s17  ;;  %s1759_s15 = scalar_lea.hbm %s3101_s0, 2048 }
  0x7e   : > { %s1754_s29 = scalar_lea.hbm %s2059_s19, 1024  ;;  %p1760_p1 = scmp.lt.s32.totalorder %s2059_s19, %s3101_s0 }
  0x7f   : > { %p1755_p13 = scmp.ne.s32.totalorder %s2059_s19, %s1754_s29  ;;  %p1761_p3 = scmp.lt.s32.totalorder %s1759_s15, %s1754_s29 }
  0x81   : > { %p1757_p0 = pnand %p1756_p8, %p1755_p13  ;;  %p1762_p4 = por %p1761_p3, %p1760_p1 }
  0x83   : > { %p1758_p2 = pneg %p1757_p0 }
  0x85   : > { %p1763_p5 = pnand %p1762_p4, %p1758_p2 }
  0x87   : > { %1766 = shalt.err (!%p1763_p5)
}
  0x88   : > { %s1767_s10 = scalar_lea.vmem %s2061_s23, 1024  ;;  %s1870_s12 = smov [#allocation2]  }
  0x89   : > { %p1768_p7 = scmp.ne.s32.totalorder %s2061_s23, %s1767_s10  ;;  %s1772_s1 = sshll.u32 %s1870_s12, 4  ;;  %s1773_s1 = int_to_ptr.vmem [resolvable:$false] %s1772_s1 }
  0x8a   : > { %s1774_s17 = scalar_lea.vmem %s1773_s1, 2048  ;;  %p1775_p0 = scmp.lt.s32.totalorder %s2061_s23, %s1773_s1 }
  0x8b   : > { %p1770_p9 = pnand %p1768_p7, %p1756_p8  ;;  %p1776_p11 = scmp.lt.s32.totalorder %s1774_s17, %s1767_s10 }
  0x8d   : > { %p1771_p13 = pneg %p1770_p9  ;;  %p1777_p10 = por %p1776_p11, %p1775_p0 }
  0x8f   : > { %p1778_p6 = pnand %p1777_p10, %p1771_p13 }
  0x91   : > { %1781 = shalt.err (!%p1778_p6)
}
  0x92   : > { %s1871_s29 = smov 128   ;;  %s1872_s18 = smov 8  }
  0x93   : > { %1537 = dma.hbm_to_vmem [thread:$0]  (!%p2065_p12), %s2059_s19, 1024, %s2061_s23, %s2069_s16, %s1871_s29, %s1871_s29, %s1872_s18  }
  0x94   : > { %p3103_p8 = scmp.ne.s32.totalorder %s3084_s9, 0 }
  0x96   : > { %312 = sbr.rel (%p3103_p8) target bundleno = 487 (0x1e7), region = 48 }
  0x9b   : > { %s2093_s15 = sand.u32 1, %s1854_s25   ;;  %p3105_p6 = scmp.ne.s32.totalorder %s3096_s11, 0 }
  0x9c   : > { %3104 = sst [smem:[#allocation31_spill]] %s2093_s15  ;;  %s1358_s1 = sshll.u32 %s2093_s15, 6 }
  0x9d   : > { %s315_s20 = scalar_lea.sflag [#allocation3], %s2093_s15  ;;  %s2097_s22 = scalar_lea.vmem [#allocation2], %s1358_s1 }
  0x9e   : > { %1825 = dma.done.wait (%p3105_p6), %s315_s20, 1024  }
  0x9f   : > { %1827 = vsyncadd (%p3105_p6), %s315_s20, 4294966272  ;;  %p3106_p10 = scmp.eq.s32.totalorder %s1942_s8, 0 }
  0xa1   : > { %1829 = dma.done.wait (%p3106_p10), [#allocation5], 16   ;;  %p3107_p11 = pmov %p3106_p10 }
  0xa2   : > { %p3108_p12 = pmov %p3106_p10 }
  0xa3   : > { %1831 = vsyncadd (%p3107_p11), [#allocation5], 4294967280 }
  0xa4   : > { %1833 = dma.done.wait (%p3108_p12), [#allocation8], 32   ;;  %p3109_p2 = pmov %p3106_p10 }
  0xa6   : > { %1835 = vsyncadd (%p3109_p2), [#allocation8], 4294967264  ;;  %p3110_p1 = pmov %p3109_p2 }
  0xa8   : > { %1837 = dma.done.wait (%p3110_p1), [#allocation11], 32   ;;  %p3111_p3 = pmov %p3110_p1 }
  0xa9   : > { %p3112_p4 = pmov %p3110_p1 }
  0xaa   : > { %1839 = vsyncadd (%p3111_p3), [#allocation11], 4294967264 }
  0xab   : > { %1841 = dma.done.wait (%p3112_p4), [#allocation14], 16   ;;  %p3113_p5 = pmov %p3110_p1 }
  0xad   : > { %1843 = vsyncadd (%p3113_p5), [#allocation14], 4294967280 }
  0xae   : > { %347 = sfence }
  0xaf   : > { %s1375_s9 = sld [smem:[#allocation6 + $0x4]]  ;;  %v2122_v0 = vld [vmem:[%s2097_s22] sm:$0xff]  ;;  %v2127_v1 = vld [vmem:[%s2097_s22 + $0x8] sm:$0xff]  ;;  %v2130_v2 = vld [vmem:[%s2097_s22 + $0x10] sm:$0xff] }
  0xb0   : > { %s1376_s11 = sld [smem:[#allocation6 + $0x5]]  ;;  %v2135_v3 = vld [vmem:[%s2097_s22 + $0x18] sm:$0xff]  ;;  %v2138_v4 = vld [vmem:[%s2097_s22 + $0x20] sm:$0xff]  ;;  %v2143_v6 = vld [vmem:[%s2097_s22 + $0x28] sm:$0xff] }
  0xb1   : > { %s1377_s19 = sld [smem:[#allocation6 + $0x6]]  ;;  %v2146_v7 = vld [vmem:[%s2097_s22 + $0x30] sm:$0xff]  ;;  %v2156_v13 = vld [vmem:[%s2097_s22 + $0x38] sm:$0xff] }
  0xb2   : > { %s2119_s23 = sld [smem:[#allocation6 + $0x7]] }
  0xb3   : > { %s2124_s21 = sld [smem:[#allocation7 + $0x1]] }
  0xb4   : > { %s2132_s16 = sld [smem:[#allocation6]] }
  0xb5   : > { %v442_v5 = vstv %s1375_s9  ;;  %s2140_s10 = sld [smem:[#allocation6 + $0x1]] }
  0xb6   : > { %v443_v8 = vmul.f32 %v442_v5, %v2122_v0  ;;  %v446_v9 = vstv %s1376_s11  ;;  %s2149_s12 = sld [smem:[#allocation6 + $0x2]]  ;;  %v444_v10 = vmul.f32 %v442_v5, %v2127_v1 }
  0xb7   : > { %v447_v11 = vmul.f32 %v2130_v2, %v446_v9  ;;  %v452_v12 = vstv %s1377_s19  ;;  %s2153_s17 = sld [smem:[#allocation6 + $0x3]]  ;;  %v448_v14 = vmul.f32 %v2135_v3, %v446_v9 }
  0xb8   : > { %v453_v15 = vmul.f32 %v2138_v4, %v452_v12  ;;  %v458_v16 = vstv %s2119_s23  ;;  %s2161_s29 = sld [smem:[#allocation7]]  ;;  %v454_v17 = vmul.f32 %v2143_v6, %v452_v12 }
  0xb9   : > { %v449_v18 = vadd.f32 %v447_v11, %v443_v8  ;;  %v459_v19 = vmul.f32 %v2146_v7, %v458_v16  ;;  %v450_v20 = vadd.f32 %v448_v14, %v444_v10  ;;  %s2165_s18 = sld [smem:[#allocation6 + $0x8]]  ;;  %v464_v21 = vstv %s2124_s21 }
  0xba   : > { %v398_v22 = vstv %s2132_s16  ;;  %v460_v23 = vmul.f32 %v2156_v13, %v458_v16  ;;  %s2170_s1 = sld [smem:[#allocation6 + $0x9]] }
  0xbb   : > { %v455_v24 = vadd.f32 %v453_v15, %v449_v18  ;;  %v399_v25 = vmul.f32 %v398_v22, %v2122_v0  ;;  %v402_v26 = vstv %s2140_s10  ;;  %v456_v27 = vadd.f32 %v454_v17, %v450_v20  ;;  %s2174_s20 = sld [smem:[#allocation6 + $0xa]]  ;;  %s1873_s10 = smov 1  }
  0xbc   : > { %v403_v28 = vmul.f32 %v2130_v2, %v402_v26  ;;  %v408_v29 = vstv %s2149_s12  ;;  %v400_v30 = vmul.f32 %v398_v22, %v2127_v1  ;;  %v404_v31 = vmul.f32 %v2135_v3, %v402_v26  ;;  %s2180_s22 = sld [smem:[#allocation6 + $0xb]]  ;;  %s1874_s12 = smov 127  }
  0xbd   : > { %v461_v32 = vadd.f32 %v459_v19, %v455_v24  ;;  %v409_v33 = vmul.f32 %v2138_v4, %v408_v29  ;;  %v414_v34 = vstv %s2153_s17  ;;  %v462_v35 = vadd.f32 %v460_v23, %v456_v27  ;;  %s2184_s9 = sld [smem:[#allocation7 + $0x2]] }
  0xbe   : > { %v405_v36 = vadd.f32 %v403_v28, %v399_v25  ;;  %v415_v37 = vmul.f32 %v2146_v7, %v414_v34  ;;  %v406_v38 = vadd.f32 %v404_v31, %v400_v30  ;;  %v410_v41 = vmul.f32 %v2143_v6, %v408_v29  ;;  %s2193_s11 = sld [smem:[#allocation6 + $0xc]] }
  0xbf   : > { %v2187_v39 = vadd.f32 %v464_v21, %v461_v32  ;;  %v2189_v40 = vadd.f32 %v464_v21, %v462_v35  ;;  %v416_v42 = vmul.f32 %v2156_v13, %v414_v34  ;;  %v420_v44 = vstv %s2161_s29  ;;  %s2198_s19 = sld [smem:[#allocation6 + $0xd]] }
  0xc0   : > { %v411_v43 = vadd.f32 %v409_v33, %v405_v36  ;;  %v486_v45 = vstv %s2165_s18  ;;  %v490_v46 = vstv %s2170_s1  ;;  %v412_v49 = vadd.f32 %v410_v41, %v406_v38  ;;  %s2203_s23 = sld [smem:[#allocation6 + $0xe]] }
  0xc1   : > { %v467_v47 = vsub.f32 0.0, %v2187_v39  ;;  %v468_v48 = vsub.f32 0.0, %v2189_v40  ;;  %v488_v50 = vmul.f32 %v486_v45, %v2127_v1  ;;  %v492_v52 = vmul.f32 %v2135_v3, %v490_v46  ;;  %s2208_s21 = sld [smem:[#allocation6 + $0xf]] }
  0xc2   : > { %v417_v51 = vadd.f32 %v415_v37, %v411_v43  ;;  %v496_v53 = vstv %s2174_s20  ;;  %v502_v54 = vstv %s2180_s22  ;;  %v418_v57 = vadd.f32 %v416_v42, %v412_v49  ;;  %s2221_s16 = sld [smem:[#allocation7 + $0x3]] }
  0xc3   : > { %v469_v55 = vmul.f32 1.442695, %v467_v47  ;;  %v471_v56 = vmul.f32 1.442695, %v468_v48  ;;  %v498_v58 = vmul.f32 %v2143_v6, %v496_v53  ;;  %v494_v60 = vadd.f32 %v492_v52, %v488_v50  ;;  %s2298_s17 = sld [smem:[#allocation9 + $0x9]] }
  0xc4   : > { %v2211_v59 = vadd.f32 %v420_v44, %v417_v51  ;;  %v504_v61 = vmul.f32 %v2156_v13, %v502_v54  ;;  %v508_v62 = vstv %s2184_s9  ;;  %v2215_v63 = vadd.f32 %v420_v44, %v418_v57  ;;  %s2300_s29 = sld [smem:[#allocation9 + $0xa]] }
  0xc5   : > { %1600 = vpow2.f32 %v469_v55  ;;  %v487_v5 = vmul.f32 %v486_v45, %v2122_v0  ;;  %v491_v8 = vmul.f32 %v2130_v2, %v490_v46  ;;  %v500_v10 = vadd.f32 %v498_v58, %v494_v60  ;;  %s2302_s18 = sld [smem:[#allocation9 + $0xc]] }
  0xc6   : > { %v423_v9 = vsub.f32 0.0, %v2211_v59  ;;  %1602 = vpow2.f32 %v471_v56  ;;  %v497_v11 = vmul.f32 %v2138_v4, %v496_v53  ;;  %v424_v12 = vsub.f32 0.0, %v2215_v63  ;;  %s2304_s1 = sld [smem:[#allocation9 + $0xd]] }
  0xc7   : > { %v493_v14 = vadd.f32 %v491_v8, %v487_v5  ;;  %v503_v15 = vmul.f32 %v2146_v7, %v502_v54  ;;  %v530_v16 = vstv %s2193_s11  ;;  %v506_v18 = vadd.f32 %v504_v61, %v500_v10  ;;  %s2306_s20 = sld [smem:[#allocation9 + $0xf]] }
  0xc8   : > { %v425_v17 = vmul.f32 1.442695, %v423_v9  ;;  %v532_v19 = vmul.f32 %v530_v16, %v2127_v1  ;;  %v534_v20 = vstv %s2198_s19  ;;  %v427_v21 = vmul.f32 1.442695, %v424_v12  ;;  %s2308_s22 = sld [smem:[#allocation9 + $0x10]] }
  0xc9   : > { %v499_v22 = vadd.f32 %v497_v11, %v493_v14  ;;  %v536_v23 = vmul.f32 %v2135_v3, %v534_v20  ;;  %v540_v24 = vstv %s2203_s23  ;;  %v2230_v25 = vadd.f32 %v508_v62, %v506_v18  ;;  %s2310_s9 = sld [smem:[#allocation9]] }
  0xca   : > { %1604 = vpow2.f32 %v425_v17  ;;  %v542_v26 = vmul.f32 %v2143_v6, %v540_v24  ;;  %v546_v27 = vstv %s2208_s21  ;;  %v531_v31 = vmul.f32 %v530_v16, %v2122_v0  ;;  %s2312_s11 = sld [smem:[#allocation9 + $0x1]] }
  0xcb   : > { %1606 = vpow2.f32 %v427_v21  ;;  %v505_v28 = vadd.f32 %v503_v15, %v499_v22  ;;  %v538_v29 = vadd.f32 %v536_v23, %v532_v19  ;;  %v548_v30 = vmul.f32 %v2156_v13, %v546_v27  ;;  %s2314_s19 = sld [smem:[#allocation9 + $0x3]] }
  0xcc   : > { %v512_v1 = vsub.f32 0.0, %v2230_v25  ;;  %v535_v32 = vmul.f32 %v2130_v2, %v534_v20  ;;  %v541_v34 = vmul.f32 %v2138_v4, %v540_v24  ;;  %v552_v36 = vstv %s2221_s16  ;;  %s2316_s23 = sld [smem:[#allocation9 + $0x4]] }
  0xcd   : > { %v2238_v3 = vadd.f32 %v508_v62, %v505_v28  ;;  %v544_v33 = vadd.f32 %v542_v26, %v538_v29  ;;  %v547_v37 = vmul.f32 %v2146_v7, %v546_v27  ;;  %s2318_s21 = sld [smem:[#allocation9 + $0x6]] }
  0xce   : > { %v515_v35 = vmul.f32 1.442695, %v512_v1  ;;  %v537_v6 = vadd.f32 %v535_v32, %v531_v31  ;;  %s2320_s16 = sld [smem:[#allocation9 + $0x7]] }
  0xcf   : > { %v511_v38 = vsub.f32 0.0, %v2238_v3  ;;  %v550_v41 = vadd.f32 %v548_v30, %v544_v33  ;;  %s2326_s0 = sld [smem:[#allocation9 + $0x8]] }
  0xd0   : > { %1608 = vpow2.f32 %v515_v35  ;;  %v543_v13 = vadd.f32 %v541_v34, %v537_v6  ;;  %s2328_s2 = sld [smem:[#allocation9 + $0xb]] }
  0xd1   : > { %v513_v42 = vmul.f32 1.442695, %v511_v38  ;;  %v2244_v43 = vadd.f32 %v552_v36, %v550_v41  ;;  %s2330_s3 = sld [smem:[#allocation9 + $0xe]] }
  0xd2   : > { %v1601_v0 = vpop.eup %1600  ;;  %v549_v2 = vadd.f32 %v547_v37, %v543_v13  ;;  %s2332_s4 = sld [smem:[#allocation10]] }
  0xd3   : > { %v1603_v44 = vpop.eup %1602  ;;  %v473_v45 = vadd.f32 1.0, %v1601_v0  ;;  %1610 = vpow2.f32 %v513_v42  ;;  %v556_v4 = vsub.f32 0.0, %v2244_v43  ;;  %s2334_s5 = sld [smem:[#allocation9 + $0x11]] }
  0xd4   : > { %v474_v46 = vadd.f32 1.0, %v1603_v44  ;;  %v2247_v47 = vadd.f32 %v552_v36, %v549_v2  ;;  %s2336_s6 = sld [smem:[#allocation10 + $0x1]]  ;;  %v686_v2 = vstv %s2298_s17  ;;  %v690_v44 = vstv %s2300_s29 }
  0xd5   : > { %1612 = vrcp.f32 %v473_v45  ;;  %v559_v7 = vmul.f32 1.442695, %v556_v4  ;;  %s2338_s30 = sld [smem:[#allocation9 + $0x12]]  ;;  %v712_v4 = vstv %s2304_s1 }
  0xd6   : > { %1614 = vrcp.f32 %v474_v46  ;;  %v555_v48 = vsub.f32 0.0, %v2247_v47  ;;  %s2340_s26 = sld [smem:[#allocation9 + $0x13]] }
  0xd7   : > { %v1605_v49 = vpop.eup %1604  ;;  %1616 = vpow2.f32 %v559_v7  ;;  %s2342_s25 = sld [smem:[#allocation9 + $0x15]] }
  0xd8   : > { %v1607_v50 = vpop.eup %1606  ;;  %v429_v51 = vadd.f32 1.0, %v1605_v49  ;;  %v557_v52 = vmul.f32 1.442695, %v555_v48  ;;  %s2344_s28 = sld [smem:[#allocation9 + $0x16]]  ;;  %v586_v48 = vstv %s2310_s9  ;;  %v590_v49 = vstv %s2312_s11 }
  0xd9   : > { %v430_v53 = vadd.f32 1.0, %v1607_v50  ;;  %s2346_s27 = sld [smem:[#allocation9 + $0x18]]  ;;  %v609_v50 = vstv %s2314_s19 }
  0xda   : > { %1618 = vrcp.f32 %v429_v51  ;;  %s2348_s14 = sld [smem:[#allocation9 + $0x19]] }
  0xdb   : > { %1620 = vrcp.f32 %v430_v53  ;;  %s2350_s24 = sld [smem:[#allocation9 + $0x14]] }
  0xdc   : > { %1622 = vpow2.f32 %v557_v52  ;;  %s2352_s13 = sld [smem:[#allocation9 + $0x17]]  ;;  %v613_v52 = vstv %s2316_s23 }
  0xdd   : > { %v1609_v54 = vpop.eup %1608  ;;  %s2356_s7 = sld [smem:[#allocation9 + $0x1a]] }
  0xde   : > { %v518_v55 = vadd.f32 1.0, %v1609_v54  ;;  %s2362_s8 = sld [smem:[#allocation10 + $0x2]]  ;;  %v631_v54 = vstv %s2320_s16 }
  0xdf   : > { %s2371_s15 = sld [smem:[#allocation9 + $0x1b]] }
  0xe0   : > { %v1611_v56 = vpop.eup %1610  ;;  %1624 = vrcp.f32 %v518_v55  ;;  %s2379_s29 = sld [smem:[#allocation9 + $0x1c]] }
  0xe1   : > { %v517_v57 = vadd.f32 1.0, %v1611_v56  ;;  %s2392_s1 = sld [smem:[#allocation9 + $0x1e]] }
  0xe2   : > { %v1613_v58 = vpop.eup %1612  ;;  %s2414_s11 = sld [smem:[#allocation9 + $0x22]] }
  0xe3   : > { %v1615_v60 = vpop.eup %1614  ;;  %v477_v61 = vmul.f32 %v1613_v58, %v473_v45  ;;  %1626 = vrcp.f32 %v517_v57  ;;  %v708_v45 = vstv %s2302_s18  ;;  %s2440_s23 = sld [smem:[#allocation9 + $0x21]] }
  0xe4   : > { %v1617_v62 = vpop.eup %1616  ;;  %v478_v5 = vmul.f32 %v1615_v60, %v474_v46  ;;  %v726_v46 = vstv %s2306_s20  ;;  %s2779_s17 = sld [smem:[#allocation12 + $0x15]] }
  0xe5   : > { %v479_v8 = vsub.f32 2.0, %v477_v61  ;;  %v562_v9 = vadd.f32 1.0, %v1617_v62  ;;  %s2784_s18 = sld [smem:[#allocation12 + $0x19]] }
  0xe6   : > { %v480_v10 = vsub.f32 2.0, %v478_v5  ;;  %s2786_s20 = sld [smem:[#allocation12 + $0x1d]] }
  0xe7   : > { %v1619_v11 = vpop.eup %1618  ;;  %v481_v12 = vmul.f32 %v1613_v58, %v479_v8  ;;  %1628 = vrcp.f32 %v562_v9  ;;  %s2814_s9 = sld [smem:[#allocation12 + $0x2]] }
  0xe8   : > { %v1621_v14 = vpop.eup %1620  ;;  %v433_v15 = vmul.f32 %v1619_v11, %v429_v51  ;;  %v482_v16 = vmul.f32 %v1615_v60, %v480_v10  ;;  %s2817_s19 = sld [smem:[#allocation12 + $0x6]] }
  0xe9   : > { %v1623_v17 = vpop.eup %1622  ;;  %v2251_v18 = vmul.f32 %v481_v12, %v2187_v39  ;;  %v434_v19 = vmul.f32 %v1621_v14, %v430_v53  ;;  %v627_v53 = vstv %s2318_s21  ;;  %s2819_s21 = sld [smem:[#allocation12 + $0xa]] }
  0xea   : > { %v435_v20 = vsub.f32 2.0, %v433_v15  ;;  %v561_v21 = vadd.f32 1.0, %v1623_v17  ;;  %v2256_v22 = vmul.f32 %v482_v16, %v2189_v40  ;;  %v788_v16 = vstv %s2340_s26  ;;  %s2450_s26 = sld [smem:[#allocation9 + $0x1d]] }
  0xeb   : > { %673 = vrot.lane.b32.xlu1 %v2251_v18, %s1873_s10  ;;  %v436_v23 = vsub.f32 2.0, %v434_v19  ;;  %v2374_v51 = vmul.f32 %v690_v44, %v2251_v18  ;;  %v696_v19 = vstv %s2328_s2  ;;  %s2719_s2 = sld [smem:[#allocation12]] }
  0xec   : > { %v437_v24 = vmul.f32 %v1619_v11, %v435_v20  ;;  %1630 = vrcp.f32 %v561_v21  ;;  %v2395_v60 = vmul.f32 %v712_v4, %v2256_v22  ;;  %v637_v11 = vstv %s2326_s0  ;;  %s2642_s0 = sld [smem:[#allocation9 + $0x23]] }
  0xed   : > { %v1625_v26 = vpop.eup %1624  ;;  %v438_v27 = vmul.f32 %v1621_v14, %v436_v23  ;;  %v718_v20 = vstv %s2330_s3  ;;  %v736_v23 = vstv %s2334_s5  ;;  %s2729_s3 = sld [smem:[#allocation10 + $0x3]] }
  0xee   : > { %v2259_v28 = vmul.f32 %v437_v24, %v2211_v59  ;;  %v522_v39 = vmul.f32 %v1625_v26, %v518_v55  ;;  %v2382_v55 = vmul.f32 %v712_v4, %v2251_v18  ;;  %v750_v24 = vstv %s2336_s6  ;;  %s2735_s5 = sld [smem:[#allocation12 + $0x8]] }
  0xef   : > { %675 = vrot.lane.b32.xlu1 %v2256_v22, %s1873_s10  ;;  %v2266_v30 = vmul.f32 %v438_v27, %v2215_v63  ;;  %s2738_s6 = sld [smem:[#allocation12 + $0xc]] }
  0xf0   : > { %v1627_v29 = vpop.eup %1626  ;;  %573 = vrot.lane.b32.xlu0 %v2259_v28, %s1873_s10  ;;  %v524_v40 = vsub.f32 2.0, %v522_v39  ;;  %v2405_v8 = vmul.f32 %v590_v49, %v2259_v28  ;;  %v2411_v10 = vmul.f32 %v631_v54, %v2259_v28  ;;  %s2825_s16 = sld [smem:[#allocation12 + $0xe]] }
  0xf1   : > { %v521_v1 = vmul.f32 %v1627_v29, %v517_v57  ;;  %v2388_v57 = vmul.f32 %v690_v44, %v2256_v22  ;;  %v2417_v12 = vmul.f32 %v590_v49, %v2266_v30  ;;  %v2420_v14 = vmul.f32 %v613_v52, %v2266_v30 }
  0xf2   : > { %v526_v31 = vmul.f32 %v1625_v26, %v524_v40  ;;  %v2423_v15 = vmul.f32 %v631_v54, %v2266_v30  ;;  %v828_v26 = vstv %s2348_s14  ;;  %s2770_s14 = sld [smem:[#allocation12 + $0xd]] }
  0xf3   : > { %581 = vrot.lane.b32.xlu1 %v2266_v30, %s1874_s12  ;;  %v523_v59 = vsub.f32 2.0, %v521_v1  ;;  %v824_v1 = vstv %s2346_s27  ;;  %s2755_s27 = sld [smem:[#allocation12 + $0x1c]] }
  0xf4   : > { %v1629_v32 = vpop.eup %1628  ;;  %575 = vrot.lane.b32.xlu0 %v2266_v30, %s1873_s10  ;;  %v2273_v34 = vmul.f32 %v526_v31, %v2230_v25 }
  0xf5   : > { %v566_v33 = vmul.f32 %v1629_v32, %v562_v9  ;;  %v525_v63 = vmul.f32 %v1627_v29, %v523_v59  ;;  %v2408_v9 = vmul.f32 %v613_v52, %v2259_v28  ;;  %v806_v29 = vstv %s2342_s25  ;;  %s2751_s25 = sld [smem:[#allocation12 + $0x18]] }
  0xf6   : > { %v2444_v39 = vmul.f32 %v788_v16, %v2273_v34 }
  0xf7   : > { %681 = vrot.lane.b32.xlu1 %v2256_v22, %s1874_s12  ;;  %v568_v35 = vsub.f32 2.0, %v566_v33  ;;  %v2280_v38 = vmul.f32 %v525_v63, %v2238_v3  ;;  %v374_v3 = vlaneseq  ;;  %v2463_v33 = vmul.f32 %v828_v26, %v2273_v34 }
  0xf8   : > { %579 = vrot.lane.b32.xlu0 %v2259_v28, %s1874_s12  ;;  %v784_v28 = vstv %s2338_s30  ;;  %v794_v63 = vstv %s2350_s24  ;;  %s2744_s24 = sld [smem:[#allocation12 + $0x14]] }
  0xf9   : > { %v1631_v36 = vpop.eup %1630  ;;  %v570_v37 = vmul.f32 %v1629_v32, %v568_v35  ;;  %v2390_v58 = vshrl.u32 %v374_v3, 7  ;;  %v2448_v30 = vmul.f32 %v788_v16, %v2280_v38  ;;  %v886_v32 = vstv %s2379_s29  ;;  %s2766_s30 = sld [smem:[#allocation12 + $0x5]] }
  0xfa   : > { %v565_v6 = vmul.f32 %v1631_v36, %v561_v21  ;;  %v810_v21 = vstv %s2344_s28  ;;  %v2466_v35 = vmul.f32 %v828_v26, %v2280_v38  ;;  %s2568_s28 = sld [smem:[#allocation9 + $0x20]] }
  0xfb   : > { %773 = vrot.lane.b32.xlu1 %v2273_v34, %s1873_s10  ;;  %v2284_v25 = vmul.f32 %v570_v37, %v2244_v43  ;;  %v375_v43 = vand.u32 127, %v374_v3  ;;  %v2453_v40 = vmul.f32 %v810_v21, %v2273_v34  ;;  %v2457_v31 = vmul.f32 %v810_v21, %v2280_v38  ;;  %s2839_s29 = sld [smem:[#allocation12 + $0x1a]] }
  0xfc   : > { %679 = vrot.lane.b32.xlu0 %v2251_v18, %s1874_s12  ;;  %v567_v41 = vsub.f32 2.0, %v565_v6  ;;  %v834_v6 = vstv %s2356_s7  ;;  %v882_v3 = vstv %s2371_s15  ;;  %vm603_vm2 = vcmp.lt.s32.totalorder %v2390_v58, 1  ;;  %s2742_s7 = sld [smem:[#allocation12 + $0x10]] }
  0xfd   : > { %v379_v0 = vand.u32 15, %v375_v43  ;;  %v2475_v43 = vmul.f32 %v886_v32, %v2284_v25  ;;  %vm381_vm3 = vcmp.ge.s32.totalorder %v2390_v58, 1  ;;  %vm644_vm4 = vcmp.lt.s32.totalorder %v2390_v58, 7  ;;  %s2776_s15 = sld [smem:[#allocation12 + $0x11]] }
  0xfe   : > { %v569_v13 = vmul.f32 %v1631_v36, %v567_v41  ;;  %v816_v36 = vstv %s2352_s13  ;;  %s2768_s13 = sld [smem:[#allocation12 + $0x9]] }
  0xff   : > { %779 = vrot.lane.b32.xlu1 %v2273_v34, %s1874_s12  ;;  %vm2364_vm0 = vcmp.ge.s32.totalorder %v379_v0, 1  ;;  %vm2426_vm1 = vcmp.lt.s32.totalorder %v379_v0, 15  ;;  %v926_v34 = vstv %s2414_s11  ;;  %s2852_s11 = sld [smem:[#allocation13]] }
 0x100   : > { %771 = vrot.lane.b32.xlu0 %v2280_v38, %s1873_s10  ;;  %v2292_v42 = vmul.f32 %v569_v13, %v2247_v47  ;;  %v730_v47 = vstv %s2308_s22  ;;  %s2402_s22 = sld [smem:[#allocation9 + $0x1f]] }
 0x101   : > { %v2385_v56 = vmul.f32 %v730_v47, %v2251_v18  ;;  %v2398_v61 = vmul.f32 %v730_v47, %v2256_v22  ;;  %v2431_v18 = vadd.s32 8, %v2390_v58  ;;  %v652_v22 = vstv %s2332_s4  ;;  %s2733_s4 = sld [smem:[#allocation12 + $0x4]] }
 0x102   : > { %v2486_v49 = vmul.f32 %v886_v32, %v2292_v42  ;;  %v2505_v32 = vmul.f32 %v926_v34, %v2292_v42 }
 0x103   : > { %871 = vrot.lane.b32.xlu1 %v2284_v25, %s1873_s10  ;;  %vm385_vm5 = vcmp.lt.s32.totalorder %v2431_v18, 15 }
 0x104   : > { %777 = vrot.lane.b32.xlu0 %v2280_v38, %s1874_s12 }
 0x106   : > { %v908_v41 = vstv %s2402_s22  ;;  %s2846_s22 = sld [smem:[#allocation12 + $0x3]] }
 0x107   : > { %877 = vrot.lane.b32.xlu1 %v2284_v25, %s1874_s12  ;;  %v2495_v21 = vmul.f32 %v908_v41, %v2284_v25 }
 0x108   : > { %869 = vrot.lane.b32.xlu0 %v2292_v42, %s1873_s10  ;;  %s2322_s10 = sld [smem:[#allocation9 + $0x2]] }
 0x10c   : > { %875 = vrot.lane.b32.xlu0 %v2292_v42, %s1874_s12  ;;  %s2324_s12 = sld [smem:[#allocation9 + $0x5]] }
 0x10e   : > { %v596_v62 = vstv %s2322_s10  ;;  %s2831_s10 = sld [smem:[#allocation12 + $0x12]] }
 0x112   : > { %v619_v5 = vstv %s2324_s12  ;;  %s2835_s12 = sld [smem:[#allocation12 + $0x16]] }
 0x15d   : > { %v674_v27 = vpop.permute.xlu1 %673 }
 0x15e   : > { %v677_v59 = vsel %vm2364_vm0, %v674_v27, 0.0  ;;  %v2499_v27 = vmul.f32 %v926_v34, %v2284_v25 }
 0x15f   : > { %v687_v38 = vmul.f32 %v686_v2, %v677_v59  ;;  %v709_v44 = vmul.f32 %v708_v45, %v677_v59  ;;  %v727_v52 = vmul.f32 %v726_v46, %v677_v59 }
 0x161   : > { %v676_v13 = vpop.permute.xlu1 %675  ;;  %v693_v25 = vadd.f32 %v2374_v51, %v687_v38 }
 0x162   : > { %v574_v4 = vpop.permute.xlu0 %573  ;;  %v678_v47 = vsel %vm2364_vm0, %v676_v13, 0.0  ;;  %v2502_v13 = vmul.f32 %v908_v41, %v2292_v42  ;;  %v2516_v41 = vadd.f32 %v2382_v55, %v709_v44 }
 0x163   : > { %v577_v54 = vsel %vm2364_vm0, %v574_v4, 0.0  ;;  %v688_v16 = vmul.f32 %v686_v2, %v678_v47  ;;  %v710_v2 = vmul.f32 %v708_v45, %v678_v47  ;;  %v728_v4 = vmul.f32 %v726_v46, %v678_v47 }
 0x164   : > { %v587_v59 = vmul.f32 %v586_v48, %v577_v54  ;;  %v610_v42 = vmul.f32 %v609_v50, %v577_v54  ;;  %v2523_v45 = vadd.f32 %v2385_v56, %v727_v52  ;;  %v628_v46 = vmul.f32 %v627_v53, %v577_v54 }
 0x165   : > { %v582_v37 = vpop.permute.xlu1 %581  ;;  %v694_v47 = vadd.f32 %v2388_v57, %v688_v16  ;;  %v716_v57 = vadd.f32 %v2395_v60, %v710_v2  ;;  %v734_v52 = vadd.f32 %v2398_v61, %v728_v4 }
 0x166   : > { %v576_v34 = vpop.permute.xlu0 %575  ;;  %v584_v0 = vsel %vm2426_vm1, %v582_v37, 0.0  ;;  %v593_v56 = vadd.f32 %v2405_v8, %v587_v59  ;;  %v616_v54 = vadd.f32 %v2408_v9, %v610_v42  ;;  %v634_v9 = vadd.f32 %v2411_v10, %v628_v46 }
 0x167   : > { %v578_v51 = vsel %vm2364_vm0, %v576_v34, 0.0  ;;  %v598_v44 = vmul.f32 %v596_v62, %v584_v0  ;;  %v639_v37 = vmul.f32 %v637_v11, %v584_v0  ;;  %v621_v61 = vmul.f32 %v619_v5, %v584_v0 }
 0x168   : > { %v588_v55 = vmul.f32 %v586_v48, %v578_v51  ;;  %v629_v38 = vmul.f32 %v627_v53, %v578_v51  ;;  %v611_v48 = vmul.f32 %v609_v50, %v578_v51 }
 0x169   : > { %v682_v53 = vpop.permute.xlu1 %681 }
 0x16a   : > { %v594_v16 = vadd.f32 %v2417_v12, %v588_v55  ;;  %v635_v34 = vadd.f32 %v2423_v15, %v629_v38  ;;  %v580_v26 = vpop.permute.xlu0 %579  ;;  %v684_v60 = vsel %vm2426_vm1, %v682_v53, 0.0  ;;  %v617_v4 = vadd.f32 %v2420_v14, %v611_v48 }
 0x16b   : > { %v583_v50 = vsel %vm2426_vm1, %v580_v26, 0.0  ;;  %v698_v8 = vmul.f32 %v696_v19, %v684_v60  ;;  %v738_v59 = vmul.f32 %v736_v23, %v684_v60  ;;  %v720_v10 = vmul.f32 %v718_v20, %v684_v60 }
 0x16c   : > { %v600_v2 = vadd.f32 %v598_v44, %v594_v16  ;;  %v641_v12 = vadd.f32 %v639_v37, %v635_v34  ;;  %v597_v15 = vmul.f32 %v596_v62, %v583_v50  ;;  %v620_v42 = vmul.f32 %v619_v5, %v583_v50 }
 0x16d   : > { %v638_v51 = vmul.f32 %v637_v11, %v583_v50  ;;  %v700_v0 = vadd.f32 %v698_v8, %v694_v47  ;;  %v740_v46 = vadd.f32 %v738_v59, %v734_v52  ;;  %v623_v44 = vadd.f32 %v621_v61, %v617_v4  ;;  %v774_v14 = vpop.permute.xlu1 %773 }
 0x16e   : > { %v602_v26 = vrot.slane %v600_v2, 7  ;;  %v599_v55 = vadd.f32 %v597_v15, %v593_v56  ;;  %v680_v38 = vpop.permute.xlu0 %679  ;;  %v643_v62 = vrot.slane %v641_v12, 1  ;;  %v622_v48 = vadd.f32 %v620_v42, %v616_v54 }
 0x16f   : > { %v640_v37 = vadd.f32 %v638_v51, %v634_v9  ;;  %v683_v5 = vsel %vm2426_vm1, %v680_v38, 0.0  ;;  %v702_v47 = vrot.slane %v700_v0, 7  ;;  %v742_v34 = vrot.slane %v740_v46, 1 }
 0x170   : > { %v601_v11 = vrot.slane %v599_v55, 7  ;;  %v697_v53 = vmul.f32 %v696_v19, %v683_v5  ;;  %v719_v56 = vmul.f32 %v718_v20, %v683_v5  ;;  %v737_v60 = vmul.f32 %v736_v23, %v683_v5 }
 0x171   : > { %v642_v16 = vrot.slane %v640_v37, 1  ;;  %v776_v54 = vsel %vm2364_vm0, %v774_v14, 0.0  ;;  %v722_v4 = vadd.f32 %v720_v10, %v716_v57  ;;  %v914_v51 = vstv %s2568_s28  ;;  %v780_v10 = vpop.permute.xlu1 %779  ;;  %s2866_s28 = sld [smem:[#allocation12 + $0xb]] }
 0x172   : > { %v604_v52 = vsel %vm603_vm2, %v601_v11, %v602_v26  ;;  %v605_v61 = vsel %vm603_vm2, %v602_v26, %v601_v11  ;;  %v699_v50 = vadd.f32 %v697_v53, %v693_v25  ;;  %v772_v59 = vpop.permute.xlu0 %771  ;;  %v739_v12 = vadd.f32 %v737_v60, %v2523_v45 }
 0x173   : > { %v606_v19 = vsel %vm381_vm3, %v605_v61, 0.0  ;;  %v625_v8 = vadd.f32 %v623_v44, %v604_v52  ;;  %v645_v20 = vsel %vm644_vm4, %v642_v16, %v643_v62  ;;  %v646_v23 = vsel %vm644_vm4, %v643_v62, %v642_v16 }
 0x174   : > { %v624_v9 = vadd.f32 %v622_v48, %v606_v19  ;;  %v648_v25 = vsel %vm385_vm5, %v646_v23, 0.0  ;;  %v701_v2 = vrot.slane %v699_v50, 7  ;;  %v721_v42 = vadd.f32 %v719_v56, %v2516_v41 }
 0x175   : > { %v650_v15 = vadd.f32 %v648_v25, %v625_v8  ;;  %v741_v46 = vrot.slane %v739_v12, 1  ;;  %v786_v41 = vmul.f32 %v784_v28, %v776_v54  ;;  %v808_v48 = vmul.f32 %v806_v29, %v776_v54  ;;  %v872_v23 = vpop.permute.xlu1 %871 }
 0x176   : > { %v649_v0 = vadd.f32 %v645_v20, %v624_v9  ;;  %v703_v26 = vsel %vm603_vm2, %v701_v2, %v702_v47  ;;  %v704_v55 = vsel %vm603_vm2, %v702_v47, %v701_v2  ;;  %v778_v47 = vpop.permute.xlu0 %777  ;;  %v775_v60 = vsel %vm2364_vm0, %v772_v59, 0.0 }
 0x177   : > { %v2603_v38 = vadd.f32 %v652_v22, %v650_v15  ;;  %v705_v45 = vsel %vm381_vm3, %v704_v55, 0.0  ;;  %v724_v57 = vadd.f32 %v722_v4, %v703_v26  ;;  %v743_v37 = vsel %vm644_vm4, %v741_v46, %v742_v34 }
 0x178   : > { %v2611_v44 = vadd.f32 %v652_v22, %v649_v0  ;;  %v723_v62 = vadd.f32 %v721_v42, %v705_v45  ;;  %v744_v5 = vsel %vm644_vm4, %v742_v34, %v741_v46  ;;  %v826_v22 = vmul.f32 %v824_v1, %v776_v54 }
 0x179   : > { %v656_v14 = vsub.f32 0.0, %v2603_v38  ;;  %v746_v11 = vsel %vm385_vm5, %v744_v5, 0.0  ;;  %v792_v52 = vadd.f32 %v2444_v39, %v786_v41  ;;  %v785_v61 = vmul.f32 %v784_v28, %v775_v60 }
 0x17a   : > { %v655_v53 = vsub.f32 0.0, %v2611_v44  ;;  %v747_v16 = vadd.f32 %v743_v37, %v723_v62  ;;  %v748_v56 = vadd.f32 %v746_v11, %v724_v57  ;;  %v825_v50 = vmul.f32 %v824_v1, %v775_v60  ;;  %v878_v62 = vpop.permute.xlu1 %877 }
 0x17b   : > { %v659_v34 = vmul.f32 1.442695, %v656_v14  ;;  %v782_v20 = vsel %vm2426_vm1, %v780_v10, 0.0  ;;  %v832_v39 = vadd.f32 %v2463_v33, %v826_v22  ;;  %v791_v28 = vadd.f32 %v2448_v30, %v785_v61 }
 0x17c   : > { %v657_v19 = vmul.f32 1.442695, %v655_v53  ;;  %v2634_v54 = vadd.f32 %v750_v24, %v747_v16  ;;  %v2638_v8 = vadd.f32 %v750_v24, %v748_v56  ;;  %v807_v1 = vmul.f32 %v806_v29, %v775_v60  ;;  %v870_v29 = vpop.permute.xlu0 %869 }
 0x17d   : > { %1632 = vpow2.f32 %v659_v34  ;;  %v796_v9 = vmul.f32 %v794_v63, %v782_v20  ;;  %v831_v25 = vadd.f32 %v2466_v35, %v825_v50  ;;  %v818_v2 = vmul.f32 %v816_v36, %v782_v20 }
 0x17e   : > { %1634 = vpow2.f32 %v657_v19  ;;  %v753_v24 = vsub.f32 0.0, %v2634_v54  ;;  %v754_v59 = vsub.f32 0.0, %v2638_v8  ;;  %v836_v33 = vmul.f32 %v834_v6, %v782_v20 }
 0x17f   : > { %v781_v30 = vsel %vm2426_vm1, %v778_v47, 0.0  ;;  %v798_v4 = vadd.f32 %v796_v9, %v792_v52  ;;  %v874_v55 = vsel %vm2364_vm0, %v872_v23, 0.0  ;;  %v814_v46 = vadd.f32 %v2453_v40, %v808_v48 }
 0x180   : > { %v755_v12 = vmul.f32 1.442695, %v753_v24  ;;  %v757_v15 = vmul.f32 1.442695, %v754_v59  ;;  %v795_v42 = vmul.f32 %v794_v63, %v781_v30  ;;  %v838_v0 = vadd.f32 %v836_v33, %v832_v39  ;;  %v876_v40 = vpop.permute.xlu0 %875 }
 0x181   : > { %v817_v26 = vmul.f32 %v816_v36, %v781_v30  ;;  %v835_v35 = vmul.f32 %v834_v6, %v781_v30  ;;  %v800_v45 = vrot.slane %v798_v4, 7  ;;  %v813_v63 = vadd.f32 %v2457_v31, %v807_v1 }
 0x182   : > { %1636 = vpow2.f32 %v755_v12  ;;  %v797_v57 = vadd.f32 %v795_v42, %v791_v28  ;;  %v840_v41 = vrot.slane %v838_v0, 1  ;;  %v820_v37 = vadd.f32 %v818_v2, %v814_v46 }
 0x183   : > { %1638 = vpow2.f32 %v757_v15  ;;  %v837_v10 = vadd.f32 %v835_v35, %v831_v25  ;;  %v884_v6 = vmul.f32 %v882_v3, %v874_v55  ;;  %v932_v5 = vstv %s2642_s0  ;;  %s2871_s0 = sld [smem:[#allocation13 + $0x2]] }
 0x184   : > { %v799_v36 = vrot.slane %v797_v57, 7  ;;  %v819_v14 = vadd.f32 %v817_v26, %v813_v63  ;;  %v3118_v22 = vstv %s2392_s1  ;;  %v3119_v53 = vstv %s2440_s23  ;;  %s2843_s1 = sld [smem:[#allocation12 + $0x1e]] }
 0x185   : > { %v839_v11 = vrot.slane %v837_v10, 1  ;;  %v906_v47 = vmul.f32 %v3118_v22, %v874_v55  ;;  %v924_v16 = vmul.f32 %v3119_v53, %v874_v55  ;;  %v873_v56 = vsel %vm2364_vm0, %v870_v29, 0.0  ;;  %s2858_s23 = sld [smem:[#allocation12 + $0x7]] }
 0x186   : > { %v801_v31 = vsel %vm603_vm2, %v799_v36, %v800_v45  ;;  %v802_v48 = vsel %vm603_vm2, %v800_v45, %v799_v36  ;;  %v880_v60 = vsel %vm2426_vm1, %v878_v62, 0.0  ;;  %v890_v20 = vadd.f32 %v2475_v43, %v884_v6 }
 0x187   : > { %v803_v34 = vsel %vm381_vm3, %v802_v48, 0.0  ;;  %v822_v52 = vadd.f32 %v820_v37, %v801_v31  ;;  %v841_v61 = vsel %vm644_vm4, %v839_v11, %v840_v41  ;;  %v842_v50 = vsel %vm644_vm4, %v840_v41, %v839_v11 }
 0x188   : > { %v821_v19 = vadd.f32 %v819_v14, %v803_v34  ;;  %v844_v7 = vsel %vm385_vm5, %v842_v50, 0.0  ;;  %v879_v39 = vsel %vm2426_vm1, %v876_v40, 0.0  ;;  %v912_v1 = vadd.f32 %v2495_v21, %v906_v47 }
 0x189   : > { %v846_v28 = vadd.f32 %v844_v7, %v822_v52  ;;  %v883_v23 = vmul.f32 %v882_v3, %v873_v56  ;;  %v3120_v24 = vstv %s2450_s26  ;;  %v930_v2 = vadd.f32 %v2499_v27, %v924_v16  ;;  %s2862_s26 = sld [smem:[#allocation13 + $0x1]] }
 0x18a   : > { %v894_v59 = vmul.f32 %v3120_v24, %v880_v60  ;;  %v1633_v9 = vpop.eup %1632  ;;  %v845_v25 = vadd.f32 %v841_v61, %v821_v19  ;;  %v3121_v33 = vmov %v3119_v53  ;;  %v934_v43 = vmul.f32 %v932_v5, %v880_v60 }
 0x18b   : > { %v923_v30 = vmul.f32 %v3121_v33, %v873_v56  ;;  %v1635_v29 = vpop.eup %1634  ;;  %v2703_v17 = vadd.f32 1.0, %v1633_v9  ;;  %v3122_v12 = vstv %s2362_s8  ;;  %v3123_v4 = vmov %v3118_v22  ;;  %s2761_s8 = sld [smem:[#allocation12 + $0x1]] }
 0x18c   : > { %v2707_v15 = vadd.f32 %v3122_v12, %v846_v28  ;;  %v905_v21 = vmul.f32 %v3123_v4, %v873_v56  ;;  %v896_v3 = vadd.f32 %v894_v59, %v890_v20  ;;  %v2711_v42 = vadd.f32 1.0, %v1635_v29 }
 0x18d   : > { %v3124_v0 = vmov %v3122_v12  ;;  %v916_v27 = vmul.f32 %v914_v51, %v880_v60  ;;  %v936_v35 = vadd.f32 %v934_v43, %v930_v2  ;;  %1640 = vrcp.f32 %v2703_v17 }
 0x18e   : > { %v2715_v26 = vadd.f32 %v3124_v0, %v845_v25  ;;  %v852_v55 = vsub.f32 0.0, %v2707_v15  ;;  %v889_v46 = vadd.f32 %v2486_v49, %v883_v23  ;;  %v3125_v45 = vmov %v3120_v24 }
 0x18f   : > { %v893_v57 = vmul.f32 %v3125_v45, %v879_v39  ;;  %1642 = vrcp.f32 %v2711_v42  ;;  %v929_v41 = vadd.f32 %v2505_v32, %v923_v30  ;;  %v915_v10 = vmul.f32 %v914_v51, %v879_v39  ;;  %v1637_v62 = vpop.eup %1636 }
 0x190   : > { %v851_v63 = vsub.f32 0.0, %v2715_v26  ;;  %v855_v37 = vmul.f32 1.442695, %v852_v55  ;;  %v898_v36 = vrot.slane %v896_v3, 7  ;;  %v933_v14 = vmul.f32 %v932_v5, %v879_v39  ;;  %v1639_v49 = vpop.eup %1638 }
 0x191   : > { %v895_v6 = vadd.f32 %v893_v57, %v889_v46  ;;  %v759_v11 = vadd.f32 1.0, %v1637_v62  ;;  %v911_v47 = vadd.f32 %v2502_v13, %v905_v21  ;;  %v938_v53 = vrot.slane %v936_v35, 1 }
 0x192   : > { %v853_v22 = vmul.f32 1.442695, %v851_v63  ;;  %v2740_v32 = vadd.f32 1.0, %v1639_v49  ;;  %1644 = vpow2.f32 %v855_v37  ;;  %v935_v16 = vadd.f32 %v933_v14, %v929_v41 }
 0x193   : > { %v897_v51 = vrot.slane %v895_v6, 7  ;;  %1646 = vrcp.f32 %v759_v11  ;;  %v918_v40 = vadd.f32 %v916_v27, %v912_v1  ;;  %v917_v5 = vadd.f32 %v915_v10, %v911_v47 }
 0x194   : > { %1648 = vrcp.f32 %v2740_v32  ;;  %v937_v48 = vrot.slane %v935_v16, 1  ;;  %v946_v50 = vstv %s2729_s3  ;;  %v968_v33 = vstv %s2719_s2  ;;  %s2877_s2 = sld [smem:[#allocation12 + $0xf]] }
 0x195   : > { %v899_v13 = vsel %vm603_vm2, %v897_v51, %v898_v36  ;;  %v900_v31 = vsel %vm603_vm2, %v898_v36, %v897_v51  ;;  %1650 = vpow2.f32 %v853_v22  ;;  %v996_v30 = vstv %s2733_s4  ;;  %s2880_s3 = sld [smem:[#allocation13 + $0x3]] }
 0x196   : > { %v901_v56 = vsel %vm381_vm3, %v900_v31, 0.0  ;;  %v920_v60 = vadd.f32 %v918_v40, %v899_v13  ;;  %v939_v52 = vsel %vm644_vm4, %v937_v48, %v938_v53  ;;  %v940_v61 = vsel %vm644_vm4, %v938_v53, %v937_v48  ;;  %s2882_s4 = sld [smem:[#allocation12 + $0x13]] }
 0x197   : > { %v919_v34 = vadd.f32 %v917_v5, %v901_v56  ;;  %v942_v19 = vsel %vm385_vm5, %v940_v61, 0.0  ;;  %v1083_v0 = vstv %s2742_s7  ;;  %v1112_v46 = vstv %s2744_s24  ;;  %s2897_s7 = sld [smem:[#allocation13 + $0x5]] }
 0x198   : > { %v944_v20 = vadd.f32 %v942_v19, %v920_v60  ;;  %v1141_v45 = vstv %s2751_s25  ;;  %v1170_v63 = vstv %s2755_s27  ;;  %v972_v10 = vstv %s2761_s8  ;;  %s2903_s24 = sld [smem:[#allocation12 + $0x1b]] }
 0x199   : > { %v943_v7 = vadd.f32 %v939_v52, %v919_v34  ;;  %v1000_v6 = vstv %s2766_s30  ;;  %v1029_v14 = vstv %s2768_s13  ;;  %v1058_v49 = vstv %s2770_s14  ;;  %s2909_s25 = sld [smem:[#allocation13 + $0x6]] }
 0x19a   : > { %v2774_v58 = vadd.f32 %v946_v50, %v944_v20  ;;  %v1641_v28 = vpop.eup %1640  ;;  %v1116_v22 = vstv %s2779_s17  ;;  %v1145_v47 = vstv %s2784_s18  ;;  %v1174_v53 = vstv %s2786_s20  ;;  %s2919_s27 = sld [smem:[#allocation12 + $0x1f]] }
 0x19b   : > { %v2772_v39 = vadd.f32 %v946_v50, %v943_v7  ;;  %v666_v1 = vmul.f32 %v1641_v28, %v2703_v17  ;;  %v1025_v17 = vstv %s2735_s5  ;;  %s2885_s5 = sld [smem:[#allocation13 + $0x4]] }
 0x19c   : > { %v1643_v18 = vpop.eup %1642  ;;  %v950_v24 = vsub.f32 0.0, %v2774_v58  ;;  %s2921_s8 = sld [smem:[#allocation13 + $0x7]] }
 0x19d   : > { %v949_v23 = vsub.f32 0.0, %v2772_v39  ;;  %v665_v59 = vmul.f32 %v1643_v18, %v2711_v42  ;;  %v668_v9 = vsub.f32 2.0, %v666_v1  ;;  %v1054_v42 = vstv %s2738_s6  ;;  %s2895_s6 = sld [smem:[#allocation12 + $0x17]] }
 0x19e   : > { %v953_v21 = vmul.f32 1.442695, %v950_v24  ;;  %s3126_s30 = sld [smem:[#allocation31_spill]] }
 0x19f   : > { %v951_v25 = vmul.f32 1.442695, %v949_v23  ;;  %v1645_v2 = vpop.eup %1644  ;;  %v667_v43 = vsub.f32 2.0, %v665_v59  ;;  %v670_v12 = vmul.f32 %v1641_v28, %v668_v9 }
 0x1a0   : > { %v1647_v29 = vpop.eup %1646  ;;  %v2791_v4 = vadd.f32 1.0, %v1645_v2 }
 0x1a1   : > { %v1649_v3 = vpop.eup %1648  ;;  %v669_v27 = vmul.f32 %v1643_v18, %v667_v43  ;;  %v763_v35 = vmul.f32 %v1647_v29, %v759_v11  ;;  %v672_v57 = vmul.f32 %v670_v12, %v2603_v38  ;;  %1652 = vpow2.f32 %v951_v25 }
 0x1a2   : > { %v1651_v55 = vpop.eup %1650  ;;  %1654 = vrcp.f32 %v2791_v4  ;;  %v764_v62 = vmul.f32 %v1649_v3, %v2740_v32  ;;  %v1087_v11 = vstv %s2776_s15  ;;  %s3127_s15 = sld [smem:[#allocation26_spill]] }
 0x1a3   : > { %v671_v41 = vmul.f32 %v669_v27, %v2611_v44  ;;  %v765_v37 = vsub.f32 2.0, %v763_v35  ;;  %v2803_v36 = vadd.f32 1.0, %v1651_v55  ;;  %1656 = vpow2.f32 %v953_v21 }
 0x1a4   : > { %v970_v38 = vmul.f32 %v968_v33, %v672_v57  ;;  %v998_v16 = vmul.f32 %v996_v30, %v672_v57  ;;  %v1027_v44 = vmul.f32 %v1025_v17, %v672_v57  ;;  %v1056_v40 = vmul.f32 %v1054_v42, %v672_v57  ;;  %s1365_s13 = sshll.u32 %s3126_s30, 7 }
 0x1a5   : > { %v969_v51 = vmul.f32 %v968_v33, %v671_v41  ;;  %v997_v5 = vmul.f32 %v996_v30, %v671_v41  ;;  %v766_v13 = vsub.f32 2.0, %v764_v62  ;;  %v767_v31 = vmul.f32 %v1647_v29, %v765_v37  ;;  %s2957_s14 = scalar_lea.vmem [#allocation15], %s1365_s13 }
 0x1a6   : > { %1658 = vrcp.f32 %v2803_v36  ;;  %v1026_v32 = vmul.f32 %v1025_v17, %v671_v41  ;;  %v1055_v48 = vmul.f32 %v1054_v42, %v671_v41  ;;  %v1084_v56 = vmul.f32 %v1083_v0, %v671_v41  ;;  %s1212_s18 = sshll.u32 %s2957_s14, 4  ;;  %s2986_s18 = int_to_ptr.vmem [resolvable:$true] %s1212_s18 }
 0x1a7   : > { %v1085_v60 = vmul.f32 %v1083_v0, %v672_v57  ;;  %v1113_v34 = vmul.f32 %v1112_v46, %v671_v41  ;;  %v1114_v52 = vmul.f32 %v1112_v46, %v672_v57  ;;  %v768_v61 = vmul.f32 %v1649_v3, %v766_v13 }
 0x1a8   : > { %v769_v50 = vmul.f32 %v767_v31, %v2634_v54  ;;  %v1142_v19 = vmul.f32 %v1141_v45, %v671_v41  ;;  %v1143_v7 = vmul.f32 %v1141_v45, %v672_v57  ;;  %v1171_v20 = vmul.f32 %v1170_v63, %v671_v41  ;;  %s1486_s17 = sshll.u32 %s3127_s15, 11 }
 0x1a9   : > { %v1172_v28 = vmul.f32 %v1170_v63, %v672_v57  ;;  %v770_v18 = vmul.f32 %v768_v61, %v2638_v8  ;;  %v1035_v13 = vstv %s2819_s21  ;;  %v1064_v31 = vstv %s2825_s16  ;;  %s3129_s16 = sld [smem:[#allocation29_spill]] }
 0x1aa   : > { %v973_v1 = vmul.f32 %v972_v10, %v769_v50  ;;  %v1001_v23 = vmul.f32 %v1000_v6, %v769_v50  ;;  %v1030_v24 = vmul.f32 %v1029_v14, %v769_v50  ;;  %v1059_v59 = vmul.f32 %v1058_v49, %v769_v50 }
 0x1ab   : > { %v1088_v9 = vmul.f32 %v1087_v11, %v769_v50  ;;  %v1117_v25 = vmul.f32 %v1116_v22, %v769_v50  ;;  %v1146_v2 = vmul.f32 %v1145_v47, %v769_v50  ;;  %v974_v54 = vmul.f32 %v972_v10, %v770_v18 }
 0x1ac   : > { %v2821_v33 = vadd.f32 %v973_v1, %v969_v51  ;;  %v1002_v30 = vmul.f32 %v1000_v6, %v770_v18  ;;  %v2823_v43 = vadd.f32 %v1001_v23, %v997_v5  ;;  %v1031_v29 = vmul.f32 %v1029_v14, %v770_v18 }
 0x1ad   : > { %v2827_v17 = vadd.f32 %v1030_v24, %v1026_v32  ;;  %v1060_v12 = vmul.f32 %v1058_v49, %v770_v18  ;;  %v2829_v21 = vadd.f32 %v1059_v59, %v1055_v48  ;;  %v976_v42 = vadd.f32 %v974_v54, %v970_v38 }
 0x1ae   : > { %v1653_v8 = vpop.eup %1652  ;;  %v1004_v0 = vadd.f32 %v1002_v30, %v998_v16  ;;  %v1089_v27 = vmul.f32 %v1087_v11, %v770_v18  ;;  %v2833_v35 = vadd.f32 %v1088_v9, %v1084_v56  ;;  %v1033_v46 = vadd.f32 %v1031_v29, %v1027_v44 }
 0x1af   : > { %v1655_v3 = vpop.eup %1654  ;;  %v1062_v45 = vadd.f32 %v1060_v12, %v1056_v40  ;;  %v1118_v57 = vmul.f32 %v1116_v22, %v770_v18  ;;  %v2837_v63 = vadd.f32 %v1117_v25, %v1113_v34  ;;  %v1147_v10 = vmul.f32 %v1145_v47, %v770_v18  ;;  %p3130_p9 = scmp.ne.s32.totalorder %s3129_s16, 0 }
 0x1b0   : > { %v1657_v55 = vpop.eup %1656  ;;  %v1091_v41 = vadd.f32 %v1089_v27, %v1085_v60  ;;  %v2841_v62 = vadd.f32 %v1146_v2, %v1142_v19  ;;  %v1175_v37 = vmul.f32 %v1174_v53, %v769_v50  ;;  %v1176_v14 = vmul.f32 %v1174_v53, %v770_v18 }
 0x1b1   : > { %v1120_v6 = vadd.f32 %v1118_v57, %v1114_v52  ;;  %v862_v49 = vmul.f32 %v1655_v3, %v2791_v4  ;;  %v2848_v11 = vadd.f32 1.0, %v1653_v8  ;;  %v1149_v38 = vadd.f32 %v1147_v10, %v1143_v7 }
 0x1b2   : > { %v2850_v22 = vadd.f32 %v1175_v37, %v1171_v20  ;;  %v2854_v47 = vadd.f32 1.0, %v1657_v55  ;;  %v2856_v53 = vadd.f32 %v1176_v14, %v1172_v28  ;;  %v978_v44 = vstv %s2814_s9 }
 0x1b3   : > { %v1659_v51 = vpop.eup %1658  ;;  %v864_v4 = vsub.f32 2.0, %v862_v49  ;;  %1660 = vrcp.f32 %v2848_v11  ;;  %v1006_v5 = vstv %s2817_s19  ;;  %v1093_v48 = vstv %s2831_s10  ;;  %s3128_s19 = sld [smem:[#allocation39_spill]]  ;;  %s1199_s10 = scalar_lea.sflag [#allocation4], %s3126_s30 }
 0x1b4   : > { %v861_v16 = vmul.f32 %v1659_v51, %v2803_v36  ;;  %1662 = vrcp.f32 %v2854_v47  ;;  %v1122_v56 = vstv %s2835_s12  ;;  %v1151_v60 = vstv %s2839_s29  ;;  %s1782_s12 = scalar_lea.vmem %s2986_s18, 2048  ;;  %s1875_s29 = smov [#allocation15]  }
 0x1b5   : > { %v866_v40 = vmul.f32 %v1655_v3, %v864_v4  ;;  %v1180_v34 = vstv %s2843_s1  ;;  %v984_v37 = vstv %s2846_s22  ;;  %v990_v14 = vstv %s2852_s11  ;;  %p1783_p7 = scmp.ne.s32.totalorder %s2986_s18, %s1782_s12  ;;  %s1786_s1 = sshll.u32 %s1875_s29, 4  ;;  %s1787_s1 = int_to_ptr.vmem [resolvable:$false] %s1786_s1 }
 0x1b6   : > { %v863_v32 = vsub.f32 2.0, %v861_v16  ;;  %v1018_v49 = vstv %s2862_s26  ;;  %v1076_v4 = vstv %s2880_s3  ;;  %v1099_v16 = vstv %s2882_s4  ;;  %s1788_s22 = scalar_lea.vmem %s1787_s1, 4096  ;;  %p1789_p8 = scmp.lt.s32.totalorder %s2986_s18, %s1787_s1 }
 0x1b7   : > { %v868_v36 = vmul.f32 %v866_v40, %v2707_v15  ;;  %v1128_v40 = vstv %s2895_s6  ;;  %p1784_p13 = pnand %p1783_p7, %p3130_p9  ;;  %p1790_p6 = scmp.lt.s32.totalorder %s1788_s22, %s1782_s12 }
 0x1b8   : > { %v865_v52 = vmul.f32 %v1659_v51, %v863_v32  ;;  %v1070_v51 = vstv %s2877_s2  ;;  %v1163_v32 = vstv %s2909_s25 }
 0x1b9   : > { %v980_v61 = vmul.f32 %v978_v44, %v868_v36  ;;  %v1008_v50 = vmul.f32 %v1006_v5, %v868_v36  ;;  %v1037_v19 = vmul.f32 %v1035_v13, %v868_v36  ;;  %v1066_v7 = vmul.f32 %v1064_v31, %v868_v36  ;;  %s2984_s21 = scalar_lea.hbm %s3128_s19, %s1486_s17  ;;  %p1785_p0 = pneg %p1784_p13 }
 0x1ba   : > { %v867_v20 = vmul.f32 %v865_v52, %v2715_v26  ;;  %v1095_v28 = vmul.f32 %v1093_v48, %v868_v36  ;;  %v1124_v18 = vmul.f32 %v1122_v56, %v868_v36  ;;  %v1153_v1 = vmul.f32 %v1151_v60, %v868_v36  ;;  %p1791_p10 = por %p1790_p6, %p1789_p8 }
 0x1bb   : > { %v2887_v15 = vadd.f32 %v980_v61, %v976_v42  ;;  %v2889_v23 = vadd.f32 %v1008_v50, %v1004_v0  ;;  %v2891_v24 = vadd.f32 %v1037_v19, %v1033_v46  ;;  %v2893_v59 = vadd.f32 %v1066_v7, %v1062_v45 }
 0x1bc   : > { %v979_v9 = vmul.f32 %v978_v44, %v867_v20  ;;  %v1007_v25 = vmul.f32 %v1006_v5, %v867_v20  ;;  %v1036_v2 = vmul.f32 %v1035_v13, %v867_v20  ;;  %v1065_v54 = vmul.f32 %v1064_v31, %v867_v20  ;;  %p1792_p11 = pnand %p1791_p10, %p1785_p0 }
 0x1bd   : > { %v1094_v26 = vmul.f32 %v1093_v48, %v867_v20  ;;  %v2899_v30 = vadd.f32 %v1095_v28, %v1091_v41  ;;  %v1123_v8 = vmul.f32 %v1122_v56, %v867_v20  ;;  %v2901_v29 = vadd.f32 %v1124_v18, %v1120_v6 }
 0x1be   : > { %v981_v12 = vadd.f32 %v979_v9, %v2821_v33  ;;  %v1009_v3 = vadd.f32 %v1007_v25, %v2823_v43  ;;  %v1038_v42 = vadd.f32 %v1036_v2, %v2827_v17  ;;  %v1067_v0 = vadd.f32 %v1065_v54, %v2829_v21 }
 0x1bf   : > { %v2912_v27 = vadd.f32 %v1094_v26, %v2833_v35  ;;  %v2915_v55 = vadd.f32 %v1123_v8, %v2837_v63  ;;  %v1152_v46 = vmul.f32 %v1151_v60, %v867_v20  ;;  %v2917_v45 = vadd.f32 %v1153_v1, %v1149_v38 }
 0x1c0   : > { %v1661_v33 = vpop.eup %1660  ;;  %v1181_v43 = vmul.f32 %v1180_v34, %v867_v20  ;;  %v1182_v17 = vmul.f32 %v1180_v34, %v868_v36  ;;  %v1041_v38 = vstv %s2866_s28  ;;  %v1105_v44 = vstv %s2885_s5 }
 0x1c1   : > { %v1663_v21 = vpop.eup %1662  ;;  %v2924_v35 = vadd.f32 %v1152_v46, %v2841_v62  ;;  %v959_v57 = vmul.f32 %v1661_v33, %v2848_v11  ;;  %v1012_v62 = vstv %s2858_s23  ;;  %v1134_v5 = vstv %s2897_s7 }
 0x1c2   : > { %v2928_v63 = vadd.f32 %v1181_v43, %v2850_v22  ;;  %v2931_v41 = vadd.f32 %v1182_v17, %v2856_v53  ;;  %v960_v10 = vmul.f32 %v1663_v21, %v2854_v47  ;;  %v1047_v22 = vstv %s2871_s0 }
 0x1c3   : > { %v961_v6 = vsub.f32 2.0, %v959_v57  ;;  %v1157_v13 = vstv %s2903_s24  ;;  %v1186_v48 = vstv %s2919_s27  ;;  %v1192_v56 = vstv %s2921_s8 }
 0x1c4   : > { %v962_v11 = vsub.f32 2.0, %v960_v10 }
 0x1c5   : > { %v963_v53 = vmul.f32 %v1661_v33, %v961_v6 }
 0x1c6   : > { %v964_v47 = vmul.f32 %v1663_v21, %v962_v11 }
 0x1c7   : > { %v965_v31 = vmul.f32 %v963_v53, %v2772_v39 }
 0x1c8   : > { %v966_v60 = vmul.f32 %v964_v47, %v2774_v58 }
 0x1c9   : > { %v985_v36 = vmul.f32 %v984_v37, %v965_v31  ;;  %v1013_v34 = vmul.f32 %v1012_v62, %v965_v31  ;;  %v1042_v52 = vmul.f32 %v1041_v38, %v965_v31  ;;  %v1071_v61 = vmul.f32 %v1070_v51, %v965_v31 }
 0x1ca   : > { %v986_v50 = vmul.f32 %v984_v37, %v966_v60  ;;  %v1014_v19 = vmul.f32 %v1012_v62, %v966_v60  ;;  %v1043_v7 = vmul.f32 %v1041_v38, %v966_v60  ;;  %v1072_v20 = vmul.f32 %v1070_v51, %v966_v60 }
 0x1cb   : > { %v987_v28 = vadd.f32 %v985_v36, %v981_v12  ;;  %v1015_v18 = vadd.f32 %v1013_v34, %v1009_v3  ;;  %v1044_v1 = vadd.f32 %v1042_v52, %v1038_v42  ;;  %v1073_v9 = vadd.f32 %v1071_v61, %v1067_v0 }
 0x1cc   : > { %v988_v39 = vadd.f32 %v986_v50, %v2887_v15  ;;  %v1016_v25 = vadd.f32 %v1014_v19, %v2889_v23  ;;  %v1045_v2 = vadd.f32 %v1043_v7, %v2891_v24  ;;  %v1074_v58 = vadd.f32 %v1072_v20, %v2893_v59 }
 0x1cd   : > { %v991_v54 = vadd.f32 %v990_v14, %v987_v28  ;;  %v1019_v26 = vadd.f32 %v1018_v49, %v1015_v18  ;;  %v1048_v8 = vadd.f32 %v1047_v22, %v1044_v1  ;;  %v1077_v46 = vadd.f32 %v1076_v4, %v1073_v9 }
 0x1ce   : > { %v992_v33 = vadd.f32 %v990_v14, %v988_v39  ;;  %v1020_v43 = vadd.f32 %v1018_v49, %v1016_v25  ;;  %v1049_v17 = vadd.f32 %v1047_v22, %v1045_v2  ;;  %v1078_v21 = vadd.f32 %v1076_v4, %v1074_v58 }
 0x1cf   : > { %993 = vst [vmem:[%s2957_s14] sm:$0xff] %v991_v54  ;;  %1436 = vst [vmem:[%s2957_s14 + $0x10] sm:$0xff] %v1019_v26  ;;  %v1100_v15 = vmul.f32 %v1099_v16, %v965_v31  ;;  %v1101_v23 = vmul.f32 %v1099_v16, %v966_v60  ;;  %v1129_v24 = vmul.f32 %v1128_v40, %v965_v31 }
 0x1d0   : > { %1443 = vst [vmem:[%s2957_s14 + $0x20] sm:$0xff] %v1048_v8  ;;  %1450 = vst [vmem:[%s2957_s14 + $0x30] sm:$0xff] %v1077_v46  ;;  %v1130_v59 = vmul.f32 %v1128_v40, %v966_v60  ;;  %v1158_v12 = vmul.f32 %v1157_v13, %v965_v31  ;;  %v1159_v3 = vmul.f32 %v1157_v13, %v966_v60 }
 0x1d1   : > { %994 = vst [vmem:[%s2957_s14 + $0x8] sm:$0xff] %v992_v33  ;;  %1437 = vst [vmem:[%s2957_s14 + $0x18] sm:$0xff] %v1020_v43  ;;  %v1187_v42 = vmul.f32 %v1186_v48, %v965_v31  ;;  %v1188_v0 = vmul.f32 %v1186_v48, %v966_v60  ;;  %v1102_v57 = vadd.f32 %v1100_v15, %v2912_v27 }
 0x1d2   : > { %1444 = vst [vmem:[%s2957_s14 + $0x28] sm:$0xff] %v1049_v17  ;;  %1451 = vst [vmem:[%s2957_s14 + $0x38] sm:$0xff] %v1078_v21  ;;  %v1103_v10 = vadd.f32 %v1101_v23, %v2899_v30  ;;  %v1131_v37 = vadd.f32 %v1129_v24, %v2915_v55  ;;  %v1132_v6 = vadd.f32 %v1130_v59, %v2901_v29 }
 0x1d3   : > { %v1160_v14 = vadd.f32 %v1158_v12, %v2924_v35  ;;  %v1161_v62 = vadd.f32 %v1159_v3, %v2917_v45  ;;  %v1189_v49 = vadd.f32 %v1187_v42, %v2928_v63  ;;  %v1190_v27 = vadd.f32 %v1188_v0, %v2931_v41 }
 0x1d4   : > { %v1106_v30 = vadd.f32 %v1105_v44, %v1102_v57  ;;  %v1107_v55 = vadd.f32 %v1105_v44, %v1103_v10  ;;  %v1135_v29 = vadd.f32 %v1134_v5, %v1131_v37  ;;  %v1136_v11 = vadd.f32 %v1134_v5, %v1132_v6 }
 0x1d5   : > { %v1164_v45 = vadd.f32 %v1163_v32, %v1160_v14  ;;  %v1165_v35 = vadd.f32 %v1163_v32, %v1161_v62  ;;  %v1193_v63 = vadd.f32 %v1192_v56, %v1189_v49  ;;  %v1194_v41 = vadd.f32 %v1192_v56, %v1190_v27 }
 0x1d6   : > { %1457 = vst [vmem:[%s2957_s14 + $0x40] sm:$0xff] %v1106_v30  ;;  %1458 = vst [vmem:[%s2957_s14 + $0x48] sm:$0xff] %v1107_v55 }
 0x1d7   : > { %1464 = vst [vmem:[%s2957_s14 + $0x50] sm:$0xff] %v1135_v29  ;;  %1465 = vst [vmem:[%s2957_s14 + $0x58] sm:$0xff] %v1136_v11 }
 0x1d8   : > { %1471 = vst [vmem:[%s2957_s14 + $0x60] sm:$0xff] %v1164_v45  ;;  %1472 = vst [vmem:[%s2957_s14 + $0x68] sm:$0xff] %v1165_v35 }
 0x1d9   : > { %1478 = vst [vmem:[%s2957_s14 + $0x70] sm:$0xff] %v1193_v63  ;;  %1479 = vst [vmem:[%s2957_s14 + $0x78] sm:$0xff] %v1194_v41 }
 0x1da   : > { %1795 = shalt.err (!%p1792_p11)
}
 0x1db   : > { %s1796_s11 = scalar_lea.hbm %s2984_s21, 2048  ;;  %s1800_s28 = scalar_lea.hbm %s3128_s19, 4096 }
 0x1dc   : > { %p1797_p12 = scmp.ne.s32.totalorder %s2984_s21, %s1796_s11  ;;  %p1801_p3 = scmp.lt.s32.totalorder %s2984_s21, %s3128_s19 }
 0x1dd   : > { %p1802_p4 = scmp.lt.s32.totalorder %s1800_s28, %s1796_s11 }
 0x1de   : > { %p1798_p2 = pnand %p1797_p12, %p3130_p9 }
 0x1df   : > { %p1803_p5 = por %p1802_p4, %p1801_p3 }
 0x1e0   : > { %p1799_p1 = pneg %p1798_p2 }
 0x1e2   : > { %p1804_p7 = pnand %p1803_p5, %p1799_p1 }
 0x1e4   : > { %1807 = shalt.err (!%p1804_p7)
}
 0x1e5   : > { %s1876_s3 = smov 128   ;;  %s1877_s4 = smov 8  }
 0x1e6   : > { %1513 = dma.vmem_to_hbm [thread:$0]  (%p3130_p9), %s2986_s18, 2048, %s2984_s21, %s1199_s10, %s1876_s3, %s1876_s3, %s1877_s4  }
 0x1e7 PF: > { %s3131_s5 = sld [smem:[#allocation22_spill]] }
 0x1e8   : > { %s3132_s6 = sld [smem:[#allocation30_spill]] }
 0x1e9   : > { %s3133_s7 = sld [smem:[#allocation25_spill]] }
 0x1ed   : > { %s1227_s24 = sand.u32 1, %s3131_s5  }
 0x1ee   : > { %p3134_p13 = scmp.ne.s32.totalorder %s3132_s6, 0  ;;  %s1228_s25 = scalar_lea.sflag [#allocation4], %s1227_s24 }
 0x1ef   : > { %p3135_p0 = scmp.ge.s32.totalorder %s3133_s7, 2 }
 0x1f1   : > { %p1539_p8 = pnand %p3135_p0, %p3134_p13 }
 0x1f3   : > { %p1540_p6 = pneg %p1539_p8 }
 0x1f5   : > { %1845 = dma.done.wait (%p1540_p6), %s1228_s25, 2048  }
 0x1f6   : > { %1847 = vsyncadd (%p1540_p6), %s1228_s25, 4294965248  ;;  %s3136_s27 = sld [smem:[#allocation27_spill]] }
 0x1f7   : > { %s3137_s24 = sld [smem:[#allocation23_spill]] }
 0x1f8   : > { %s3138_s25 = sld [smem:[#allocation24_spill]] }
 0x1f9   : > { %s3139_s26 = sld [smem:[#allocation28_spill]] }
 0x1fc   : > { %p24_p10 = scmp.ge.s32.totalorder %s3136_s27, 4  }
 0x1fe   :  { %26 = sbr.rel (!%p24_p10) target bundleno = 18 (0x12), region = 128 }
 0x203   :  { %1233 = vsyncpa [#allocation3], 1 }
 0x204   :  { %1235 = vsyncpa [#allocation3 + $0x1], 1 }
 0x205   :  { %1236 = vsyncpa [#allocation4], 1 }
 0x206   :  { %1238 = vsyncpa [#allocation4 + $0x1], 1 }
 0x207   :  { %1239 = vsyncpa [#allocation5], 1 }
 0x208   :  { %1241 = vsyncpa [#allocation5 + $0x1], 1 }
 0x209   :  { %1242 = vsyncpa [#allocation8], 1 }
 0x20a   :  { %1243 = vsyncpa [#allocation11], 1 }
 0x20b   :  { %1244 = vsyncpa [#allocation14], 1 }

</bundles_post_ra>
